<compile_context>
chip_gen: v6e
topology: v6e:2x2x1
jax: 0.10.0
libtpu: 0.0.40
codegen_flags: <defaults>
</compile_context>

<pallas_src>
import jax
import jax.numpy as jnp
from jax.experimental import pallas as pl
from jax.experimental.pallas import tpu as pltpu

# --- small, deterministic model config (production defaults: width=768, depth=12) ---
WIDTH = 64
DEPTH = 2
HEADS = 4
HEAD_DIM = WIDTH // HEADS
MLP_HIDDEN = 4 * WIDTH        # timm mlp_ratio = 4
LN_EPS = 1e-6                 # timm VisionTransformer LayerNorm eps
BATCH = 2
SEQ = 8


# ----------------------------- shared math helpers -----------------------------
def _layernorm(x, g, b, eps=LN_EPS):
    mu = jnp.mean(x, axis=-1, keepdims=True)
    var = jnp.mean((x - mu) ** 2, axis=-1, keepdims=True)
    return (x - mu) * jax.lax.rsqrt(var + eps) * g + b


# ----------------------------- in-kernel-only helpers ---------------------------
def _erf_approx(x):
    # Abramowitz & Stegun 7.1.26 (max abs error ~1.5e-7) — exp/mul/add only.
    # TODO(synk): swap for jax.lax.erf inside the kernel once Mosaic lowering is guaranteed.
    a1, a2, a3, a4, a5 = 0.254829592, -0.284496736, 1.421413741, -1.453152027, 1.061405429
    p = 0.3275911
    ax = jnp.abs(x)
    t = pl.reciprocal(1.0 + p * ax, approx=True)          # EUP slot, frees VALU
    poly = ((((a5 * t + a4) * t + a3) * t + a2) * t + a1) * t
    y = 1.0 - poly * jnp.exp(-ax * ax)
    return jnp.where(x >= 0, y, -y)


def _gelu_exact(x):
    # nn.GELU default in timm blocks is the exact (erf) GELU.
    return 0.5 * x * (1.0 + _erf_approx(x * 0.7071067811865476))


# ------------------------------- fused Pallas kernel ----------------------------
def fused_vit_kernel(x_ref,
                     ln1g_ref, ln1b_ref,
                     wqkv_ref, bqkv_ref,
                     wpj_ref, bpj_ref,
                     ln2g_ref, ln2b_ref,
                     wf1_ref, bf1_ref, wf2_ref, bf2_ref,
                     ng_ref, nb_ref,
                     o_ref, x_vmem):
    l = pl.program_id(1)                                   # layer axis (innermost)
    D, Dh, H = WIDTH, HEAD_DIM, HEADS

    # Load this batch element's activations into the resident VMEM carry on layer 0.
    # (x's block index only depends on the batch axis, so it is DMA'd once per b.)
    @pl.when(l == 0)
    def _():
        x_vmem[...] = x_ref[0].astype(jnp.float32)

    x = x_vmem[...]                                        # (N, D) f32

    # ---- attention branch: x = x + proj(MHSA(LN1(x))) ----
    h = _layernorm(x, ln1g_ref[0], ln1b_ref[0])            # (N, D)

    # Single fused QKV projection (full 3D-wide RHS; scale folded into q columns).
    qkv = jnp.dot(h, wqkv_ref[0],
                  preferred_element_type=jnp.float32) + bqkv_ref[0]     # (N, 3D)

    # Heads: lanes -> leading axis (static lane slices + leading-axis stack).
    def split_heads(base):
        return jnp.stack(
            [qkv[:, base + hh * Dh: base + (hh + 1) * Dh] for hh in range(H)],
            axis=0)                                        # (H, N, Dh)

    q = split_heads(0)
    k = split_heads(D)
    v = split_heads(2 * D)

    # Heads-batched attention (single batch dim, flash pattern).
    s = jnp.einsum('hnf,hmf->hnm', q, k,
                   preferred_element_type=jnp.float32)     # (H, N, N)
    s = s - jnp.max(s, axis=-1, keepdims=True)
    p = jnp.exp(s)
    p = p / jnp.sum(p, axis=-1, keepdims=True)             # exact normalizer (see review)
    o = jnp.einsum('hnm,hmf->hnf', p, v,
                   preferred_element_type=jnp.float32)     # (H, N, Dh)

    # Heads back onto lanes, then ONE full-K output projection.
    o_m = jnp.concatenate([o[hh] for hh in range(H)], axis=-1)          # (N, D)
    attn = jnp.dot(o_m, wpj_ref[0],
                   preferred_element_type=jnp.float32) + bpj_ref[0]
    x = x + attn

    # ---- MLP branch: x = x + fc2(GELU(fc1(LN2(x)))) ----
    # TODO(synk): at width=768 stream wf1/wf2 in bf16 and K-tile the 3072 hidden dim
    # with an extra grid axis (mandatory on v7x's 64 MiB VMEM, beneficial on v6e/v5e).
    h2 = _layernorm(x, ln2g_ref[0], ln2b_ref[0])
    m = jnp.dot(h2, wf1_ref[0], preferred_element_type=jnp.float32) + bf1_ref[0]
    m = _gelu_exact(m)
    m = jnp.dot(m, wf2_ref[0], preferred_element_type=jnp.float32) + bf2_ref[0]
    x = x + m

    x_vmem[...] = x                                        # carry to next layer

    # Fused trailing LayerNorm (end_norm=True); output block is written only on the
    # last (innermost) layer step, then flushed when the batch block index advances.
    @pl.when(l == pl.num_programs(1) - 1)
    def _():
        o_ref[0] = _layernorm(x, ng_ref[...], nb_ref[...]).astype(o_ref.dtype)


# ------------------------ wrapper-side weight packing ----------------------------
def pack_params(layer_params):
    """Stack per-layer params over DEPTH (original (in, out) layouts are kept so the
    kernel runs fused full-width matmuls).  Folds the softmax scale head_dim**-0.5
    into the q columns of Wqkv / bqkv (free, outside the kernel)."""
    scale = HEAD_DIM ** -0.5
    D = WIDTH

    def stack(i):
        return jnp.stack([lp[i] for lp in layer_params], axis=0)

    ln1g, ln1b = stack(0), stack(1)                        # (L, 1, D)
    wqkv, bqkv = stack(2), stack(3)                        # (L, D, 3D), (L, 1, 3D)
    wproj, bproj = stack(4), stack(5)                      # (L, D, D), (L, 1, D)
    ln2g, ln2b = stack(6), stack(7)
    wfc1, bfc1 = stack(8), stack(9)                        # (L, D, HM), (L, 1, HM)
    wfc2, bfc2 = stack(10), stack(11)                      # (L, HM, D), (L, 1, D)

    q_scale = jnp.concatenate([jnp.full((D,), scale, jnp.float32),
                               jnp.ones((2 * D,), jnp.float32)], axis=0)   # (3D,)
    wqkv = wqkv * q_scale[None, None, :]
    bqkv = bqkv * q_scale[None, None, :]

    # NOTE(prod): cast weights to bf16 here for v6e/v7x MXU rate + halved DMA (keep
    # preferred_element_type=f32 in the kernel); f32 is kept at this toy width=64.
    return (ln1g, ln1b, wqkv, bqkv, wproj, bproj,
            ln2g, ln2b, wfc1, bfc1, wfc2, bfc2)


def vit_blocks_forward(x, layer_params, norm_g, norm_b):
    B, N, D = x.shape
    packed = pack_params(layer_params)

    def w_spec(p):
        nd = p.ndim
        return pl.BlockSpec((1,) + p.shape[1:],
                            lambda b, l, _n=nd: (l,) + (0,) * (_n - 1))

    in_specs = [pl.BlockSpec((1, N, D), lambda b, l: (b, 0, 0))]      # x: per-batch block
    in_specs += [w_spec(p) for p in packed]                           # weights: per-layer
    in_specs += [pl.BlockSpec(norm_g.shape, lambda b, l: (0, 0)),     # trailing LN
                 pl.BlockSpec(norm_b.shape, lambda b, l: (0, 0))]

    out = pl.pallas_call(
        fused_vit_kernel,
        out_shape=jax.ShapeDtypeStruct((B, N, D), x.dtype),
        grid=(B, DEPTH),                       # batch (parallel) x layers (arbitrary, innermost)
        in_specs=in_specs,
        out_specs=pl.BlockSpec((1, N, D), lambda b, l: (b, 0, 0)),
        scratch_shapes=[pltpu.VMEM((N, D), jnp.float32)],             # activation carry
        compiler_params=pltpu.CompilerParams(
            dimension_semantics=("parallel", "arbitrary")),
    )(x, *packed, norm_g, norm_b)
    return out


# ----------------------------- deterministic init --------------------------------
def init_params(key):
    D, H3, HM = WIDTH, 3 * WIDTH, MLP_HIDDEN
    layers = []
    for _ in range(DEPTH):
        key, k1, k2, k3, k4, k5, k6, k7, k8 = jax.random.split(key, 9)
        layers.append((
            jnp.ones((1, D), jnp.float32),                        # ln1 gamma
            jnp.zeros((1, D), jnp.float32),                       # ln1 beta
            0.02 * jax.random.normal(k1, (D, H3), jnp.float32),   # W_qkv  (in, out)
            0.02 * jax.random.normal(k2, (1, H3), jnp.float32),   # b_qkv
            0.02 * jax.random.normal(k3, (D, D), jnp.float32),    # W_proj
            0.02 * jax.random.normal(k4, (1, D), jnp.float32),    # b_proj
            jnp.ones((1, D), jnp.float32),                        # ln2 gamma
            jnp.zeros((1, D), jnp.float32),                       # ln2 beta
            0.02 * jax.random.normal(k5, (D, HM), jnp.float32),   # W_fc1
            0.02 * jax.random.normal(k6, (1, HM), jnp.float32),   # b_fc1
            0.02 * jax.random.normal(k7, (HM, D), jnp.float32),   # W_fc2
            0.02 * jax.random.normal(k8, (1, D), jnp.float32),    # b_fc2
        ))
    norm_g = jnp.ones((1, WIDTH), jnp.float32)
    norm_b = jnp.zeros((1, WIDTH), jnp.float32)
    return layers, norm_g, norm_b


# ----------------------------- pure-JAX reference ---------------------------------
def ref_forward(x, layer_params, norm_g, norm_b):
    B, N, D = x.shape
    scale = HEAD_DIM ** -0.5
    for (ln1g, ln1b, wqkv, bqkv, wproj, bproj,
         ln2g, ln2b, wfc1, bfc1, wfc2, bfc2) in layer_params:
        h = _layernorm(x, ln1g, ln1b)
        qkv = h @ wqkv + bqkv
        q, k, v = jnp.split(qkv, 3, axis=-1)
        q = q.reshape(B, N, HEADS, HEAD_DIM).transpose(0, 2, 1, 3)
        k = k.reshape(B, N, HEADS, HEAD_DIM).transpose(0, 2, 1, 3)
        v = v.reshape(B, N, HEADS, HEAD_DIM).transpose(0, 2, 1, 3)
        s = jnp.einsum('bhnd,bhmd->bhnm', q * scale, k)
        p = jax.nn.softmax(s, axis=-1)
        o = jnp.einsum('bhnm,bhmd->bhnd', p, v).transpose(0, 2, 1, 3).reshape(B, N, D)
        x = x + (o @ wproj + bproj)
        h2 = _layernorm(x, ln2g, ln2b)
        m = h2 @ wfc1 + bfc1
        m = jax.nn.gelu(m, approximate=False)          # exact erf GELU (nn.GELU default)
        x = x + (m @ wfc2 + bfc2)
    return _layernorm(x, norm_g, norm_b)


# ------------------------------------ main ----------------------------------------
if __name__ == "__main__":
    key = jax.random.PRNGKey(0)
    key, xk, pk = jax.random.split(key, 3)
    x = jax.random.normal(xk, (BATCH, SEQ, WIDTH), jnp.float32)
    layer_params, norm_g, norm_b = init_params(pk)

    out = vit_blocks_forward(x, layer_params, norm_g, norm_b)
    out = jax.block_until_ready(out)

    ref = ref_forward(x, layer_params, norm_g, norm_b)
    max_err = float(jnp.max(jnp.abs(out - ref)))
    assert out.shape == (BATCH, SEQ, WIDTH), out.shape
    assert max_err < 1e-3, f"mismatch vs reference: {max_err}"

    print("KERNEL_OK")
</pallas_src>

<mosaic_0001>
module attributes {stable_mosaic.version = 11 : i64} {
  func.func @fused_vit_kernel(%arg0: i32, %arg1: i32, %arg2: memref<1x8x64xf32, #tpu.memory_space<vmem>>, %arg3: memref<1x1x64xf32, #tpu.memory_space<vmem>>, %arg4: memref<1x1x64xf32, #tpu.memory_space<vmem>>, %arg5: memref<1x64x192xf32, #tpu.memory_space<vmem>>, %arg6: memref<1x1x192xf32, #tpu.memory_space<vmem>>, %arg7: memref<1x64x64xf32, #tpu.memory_space<vmem>>, %arg8: memref<1x1x64xf32, #tpu.memory_space<vmem>>, %arg9: memref<1x1x64xf32, #tpu.memory_space<vmem>>, %arg10: memref<1x1x64xf32, #tpu.memory_space<vmem>>, %arg11: memref<1x64x256xf32, #tpu.memory_space<vmem>>, %arg12: memref<1x1x256xf32, #tpu.memory_space<vmem>>, %arg13: memref<1x256x64xf32, #tpu.memory_space<vmem>>, %arg14: memref<1x1x64xf32, #tpu.memory_space<vmem>>, %arg15: memref<1x64xf32, #tpu.memory_space<vmem>>, %arg16: memref<1x64xf32, #tpu.memory_space<vmem>>, %arg17: memref<1x8x64xf32, #tpu.memory_space<vmem>>, %arg18: memref<8x64xf32, #tpu.memory_space<vmem>>) attributes {dimension_semantics = [#tpu.dimension_semantics<parallel>, #tpu.dimension_semantics<arbitrary>], iteration_bounds = array<i64: 2, 2>, scalar_prefetch = 0 : i64, scratch_operands = 1 : i64, tpu.core_type = #tpu.core_type<tc>, window_params = [{transform_indices = @transform_0, window_bounds = array<i64: 1, 8, 64>}, {transform_indices = @transform_1, window_bounds = array<i64: 1, 1, 64>}, {transform_indices = @transform_2, window_bounds = array<i64: 1, 1, 64>}, {transform_indices = @transform_3, window_bounds = array<i64: 1, 64, 192>}, {transform_indices = @transform_4, window_bounds = array<i64: 1, 1, 192>}, {transform_indices = @transform_5, window_bounds = array<i64: 1, 64, 64>}, {transform_indices = @transform_6, window_bounds = array<i64: 1, 1, 64>}, {transform_indices = @transform_7, window_bounds = array<i64: 1, 1, 64>}, {transform_indices = @transform_8, window_bounds = array<i64: 1, 1, 64>}, {transform_indices = @transform_9, window_bounds = array<i64: 1, 64, 256>}, {transform_indices = @transform_10, window_bounds = array<i64: 1, 1, 256>}, {transform_indices = @transform_11, window_bounds = array<i64: 1, 256, 64>}, {transform_indices = @transform_12, window_bounds = array<i64: 1, 1, 64>}, {pipeline_mode = #tpu.pipeline_mode<synchronous>, transform_indices = @transform_13, window_bounds = array<i64: 1, 64>}, {pipeline_mode = #tpu.pipeline_mode<synchronous>, transform_indices = @transform_14, window_bounds = array<i64: 1, 64>}, {transform_indices = @transform_15, window_bounds = array<i64: 1, 8, 64>}]} {
    %c0_i32 = arith.constant 0 : i32
    %0 = arith.cmpi eq, %arg1, %c0_i32 : i32
    %1 = arith.extui %0 : i1 to i32
    %c0_i32_0 = arith.constant 0 : i32
    %2 = arith.cmpi ne, %1, %c0_i32_0 : i32
    scf.if %2 {
      %c0_72 = arith.constant 0 : index
      %c0_73 = arith.constant 0 : index
      %c0_74 = arith.constant 0 : index
      %176 = vector.load %arg2[%c0_72, %c0_73, %c0_74] : memref<1x8x64xf32, #tpu.memory_space<vmem>>, vector<1x8x64xf32>
      %177 = vector.shape_cast %176 : vector<1x8x64xf32> to vector<8x64xf32>
      %c0_75 = arith.constant 0 : index
      %c0_76 = arith.constant 0 : index
      %178 = vector.load %arg18[%c0_75, %c0_76] : memref<8x64xf32, #tpu.memory_space<vmem>>, vector<8x64xf32>
      tpu.vector_store %arg18[%c0_75, %c0_76], %177 {strides = array<i32>} : memref<8x64xf32, #tpu.memory_space<vmem>>, vector<8x64xf32>,
    } else {
    }
    %c0 = arith.constant 0 : index
    %c0_1 = arith.constant 0 : index
    %3 = vector.load %arg18[%c0, %c0_1] : memref<8x64xf32, #tpu.memory_space<vmem>>, vector<8x64xf32>
    %c0_2 = arith.constant 0 : index
    %c0_3 = arith.constant 0 : index
    %c0_4 = arith.constant 0 : index
    %4 = vector.load %arg3[%c0_2, %c0_3, %c0_4] : memref<1x1x64xf32, #tpu.memory_space<vmem>>, vector<1x1x64xf32>
    %5 = vector.shape_cast %4 : vector<1x1x64xf32> to vector<1x64xf32>
    %c0_5 = arith.constant 0 : index
    %c0_6 = arith.constant 0 : index
    %c0_7 = arith.constant 0 : index
    %6 = vector.load %arg4[%c0_5, %c0_6, %c0_7] : memref<1x1x64xf32, #tpu.memory_space<vmem>>, vector<1x1x64xf32>
    %7 = vector.shape_cast %6 : vector<1x1x64xf32> to vector<1x64xf32>
    %cst = arith.constant dense<0.000000e+00> : vector<8xf32>
    %8 = vector.multi_reduction <add>, %3, %cst [1] : vector<8x64xf32> to vector<8xf32>
    %9 = vector.shape_cast %8 : vector<8xf32> to vector<8x1xf32>
    %cst_8 = arith.constant 6.400000e+01 : f32
    %10 = vector.broadcast %cst_8 : f32 to vector<8x1xf32>
    %11 = arith.divf %9, %10 : vector<8x1xf32>
    %12 = vector.broadcast %11 : vector<8x1xf32> to vector<8x64xf32>
    %13 = arith.subf %3, %12 : vector<8x64xf32>
    %14 = arith.mulf %13, %13 : vector<8x64xf32>
    %cst_9 = arith.constant dense<0.000000e+00> : vector<8xf32>
    %15 = vector.multi_reduction <add>, %14, %cst_9 [1] : vector<8x64xf32> to vector<8xf32>
    %16 = vector.shape_cast %15 : vector<8xf32> to vector<8x1xf32>
    %cst_10 = arith.constant 6.400000e+01 : f32
    %17 = vector.broadcast %cst_10 : f32 to vector<8x1xf32>
    %18 = arith.divf %16, %17 : vector<8x1xf32>
    %19 = vector.broadcast %11 : vector<8x1xf32> to vector<8x64xf32>
    %20 = arith.subf %3, %19 : vector<8x64xf32>
    %cst_11 = arith.constant 9.99999997E-7 : f32
    %21 = vector.broadcast %cst_11 : f32 to vector<8x1xf32>
    %22 = arith.addf %18, %21 : vector<8x1xf32>
    %23 = math.rsqrt %22 : vector<8x1xf32>
    %24 = vector.broadcast %23 : vector<8x1xf32> to vector<8x64xf32>
    %25 = arith.mulf %20, %24 : vector<8x64xf32>
    %26 = vector.broadcast %5 : vector<1x64xf32> to vector<8x64xf32>
    %27 = arith.mulf %25, %26 : vector<8x64xf32>
    %28 = vector.broadcast %7 : vector<1x64xf32> to vector<8x64xf32>
    %29 = arith.addf %27, %28 : vector<8x64xf32>
    %c0_12 = arith.constant 0 : index
    %c0_13 = arith.constant 0 : index
    %c0_14 = arith.constant 0 : index
    %30 = vector.load %arg5[%c0_12, %c0_13, %c0_14] : memref<1x64x192xf32, #tpu.memory_space<vmem>>, vector<1x64x192xf32>
    %31 = vector.shape_cast %30 : vector<1x64x192xf32> to vector<64x192xf32>
    %cst_15 = arith.constant dense<0.000000e+00> : vector<8x192xf32>
    %32 = tpu.matmul %29, %31, %cst_15 {dimension_numbers = #tpu.dot_dimension_numbers<[1], [0], [0], [1], [0, 0, 1, 1], [], []>} : vector<8x64xf32>, vector<64x192xf32>, vector<8x192xf32> -> vector<8x192xf32>
    %c0_16 = arith.constant 0 : index
    %c0_17 = arith.constant 0 : index
    %c0_18 = arith.constant 0 : index
    %33 = vector.load %arg6[%c0_16, %c0_17, %c0_18] : memref<1x1x192xf32, #tpu.memory_space<vmem>>, vector<1x1x192xf32>
    %34 = vector.shape_cast %33 : vector<1x1x192xf32> to vector<1x192xf32>
    %35 = vector.broadcast %34 : vector<1x192xf32> to vector<8x192xf32>
    %36 = arith.addf %32, %35 : vector<8x192xf32>
    %37 = vector.extract_strided_slice %36 {offsets = [0, 0], sizes = [8, 16], strides = [1, 1]} : vector<8x192xf32> to vector<8x16xf32>
    %38 = vector.extract_strided_slice %36 {offsets = [0, 16], sizes = [8, 16], strides = [1, 1]} : vector<8x192xf32> to vector<8x16xf32>
    %39 = vector.extract_strided_slice %36 {offsets = [0, 32], sizes = [8, 16], strides = [1, 1]} : vector<8x192xf32> to vector<8x16xf32>
    %40 = vector.extract_strided_slice %36 {offsets = [0, 48], sizes = [8, 16], strides = [1, 1]} : vector<8x192xf32> to vector<8x16xf32>
    %41 = vector.shape_cast %37 : vector<8x16xf32> to vector<1x8x16xf32>
    %42 = vector.shape_cast %38 : vector<8x16xf32> to vector<1x8x16xf32>
    %43 = vector.shape_cast %39 : vector<8x16xf32> to vector<1x8x16xf32>
    %44 = vector.shape_cast %40 : vector<8x16xf32> to vector<1x8x16xf32>
    %45 = tpu.concatenate %41, %42, %43, %44 in 0 : vector<1x8x16xf32>, vector<1x8x16xf32>, vector<1x8x16xf32>, vector<1x8x16xf32> -> vector<4x8x16xf32>
    %46 = vector.extract_strided_slice %36 {offsets = [0, 64], sizes = [8, 16], strides = [1, 1]} : vector<8x192xf32> to vector<8x16xf32>
    %47 = vector.extract_strided_slice %36 {offsets = [0, 80], sizes = [8, 16], strides = [1, 1]} : vector<8x192xf32> to vector<8x16xf32>
    %48 = vector.extract_strided_slice %36 {offsets = [0, 96], sizes = [8, 16], strides = [1, 1]} : vector<8x192xf32> to vector<8x16xf32>
    %49 = vector.extract_strided_slice %36 {offsets = [0, 112], sizes = [8, 16], strides = [1, 1]} : vector<8x192xf32> to vector<8x16xf32>
    %50 = vector.shape_cast %46 : vector<8x16xf32> to vector<1x8x16xf32>
    %51 = vector.shape_cast %47 : vector<8x16xf32> to vector<1x8x16xf32>
    %52 = vector.shape_cast %48 : vector<8x16xf32> to vector<1x8x16xf32>
    %53 = vector.shape_cast %49 : vector<8x16xf32> to vector<1x8x16xf32>
    %54 = tpu.concatenate %50, %51, %52, %53 in 0 : vector<1x8x16xf32>, vector<1x8x16xf32>, vector<1x8x16xf32>, vector<1x8x16xf32> -> vector<4x8x16xf32>
    %55 = vector.extract_strided_slice %36 {offsets = [0, 128], sizes = [8, 16], strides = [1, 1]} : vector<8x192xf32> to vector<8x16xf32>
    %56 = vector.extract_strided_slice %36 {offsets = [0, 144], sizes = [8, 16], strides = [1, 1]} : vector<8x192xf32> to vector<8x16xf32>
    %57 = vector.extract_strided_slice %36 {offsets = [0, 160], sizes = [8, 16], strides = [1, 1]} : vector<8x192xf32> to vector<8x16xf32>
    %58 = vector.extract_strided_slice %36 {offsets = [0, 176], sizes = [8, 16], strides = [1, 1]} : vector<8x192xf32> to vector<8x16xf32>
    %59 = vector.shape_cast %55 : vector<8x16xf32> to vector<1x8x16xf32>
    %60 = vector.shape_cast %56 : vector<8x16xf32> to vector<1x8x16xf32>
    %61 = vector.shape_cast %57 : vector<8x16xf32> to vector<1x8x16xf32>
    %62 = vector.shape_cast %58 : vector<8x16xf32> to vector<1x8x16xf32>
    %63 = tpu.concatenate %59, %60, %61, %62 in 0 : vector<1x8x16xf32>, vector<1x8x16xf32>, vector<1x8x16xf32>, vector<1x8x16xf32> -> vector<4x8x16xf32>
    "tpu.trace_start"() <{level = 10 : i32, message = "hnf,hmf->hnm"}> : () -> ()
    %cst_19 = arith.constant dense<0.000000e+00> : vector<4x8x8xf32>
    %64 = tpu.matmul %45, %54, %cst_19 {dimension_numbers = #tpu.dot_dimension_numbers<[2], [2], [1], [1], [0, 0, 0, 1, 1, 1], [0], [0]>} : vector<4x8x16xf32>, vector<4x8x16xf32>, vector<4x8x8xf32> -> vector<4x8x8xf32>
    "tpu.trace_stop"() : () -> ()
    %cst_20 = arith.constant dense<0xFF800000> : vector<4x8xf32>
    %65 = vector.multi_reduction <maximumf>, %64, %cst_20 [2] : vector<4x8x8xf32> to vector<4x8xf32>
    %66 = vector.shape_cast %65 : vector<4x8xf32> to vector<4x8x1xf32>
    %67 = vector.broadcast %66 : vector<4x8x1xf32> to vector<4x8x8xf32>
    %68 = arith.subf %64, %67 : vector<4x8x8xf32>
    %69 = math.exp %68 : vector<4x8x8xf32>
    %cst_21 = arith.constant dense<0.000000e+00> : vector<4x8xf32>
    %70 = vector.multi_reduction <add>, %69, %cst_21 [2] : vector<4x8x8xf32> to vector<4x8xf32>
    %71 = vector.shape_cast %70 : vector<4x8xf32> to vector<4x8x1xf32>
    %72 = vector.broadcast %71 : vector<4x8x1xf32> to vector<4x8x8xf32>
    %73 = arith.divf %69, %72 : vector<4x8x8xf32>
    "tpu.trace_start"() <{level = 10 : i32, message = "hnm,hmf->hnf"}> : () -> ()
    %cst_22 = arith.constant dense<0.000000e+00> : vector<4x8x16xf32>
    %74 = tpu.matmul %73, %63, %cst_22 {dimension_numbers = #tpu.dot_dimension_numbers<[2], [1], [1], [2], [0, 0, 0, 1, 1, 2], [0], [0]>} : vector<4x8x8xf32>, vector<4x8x16xf32>, vector<4x8x16xf32> -> vector<4x8x16xf32>
    "tpu.trace_stop"() : () -> ()
    %75 = vector.extract_strided_slice %74 {offsets = [0, 0, 0], sizes = [1, 8, 16], strides = [1, 1, 1]} : vector<4x8x16xf32> to vector<1x8x16xf32>
    %76 = vector.shape_cast %75 : vector<1x8x16xf32> to vector<8x16xf32>
    %77 = vector.extract_strided_slice %74 {offsets = [1, 0, 0], sizes = [1, 8, 16], strides = [1, 1, 1]} : vector<4x8x16xf32> to vector<1x8x16xf32>
    %78 = vector.shape_cast %77 : vector<1x8x16xf32> to vector<8x16xf32>
    %79 = vector.extract_strided_slice %74 {offsets = [2, 0, 0], sizes = [1, 8, 16], strides = [1, 1, 1]} : vector<4x8x16xf32> to vector<1x8x16xf32>
    %80 = vector.shape_cast %79 : vector<1x8x16xf32> to vector<8x16xf32>
    %81 = vector.extract_strided_slice %74 {offsets = [3, 0, 0], sizes = [1, 8, 16], strides = [1, 1, 1]} : vector<4x8x16xf32> to vector<1x8x16xf32>
    %82 = vector.shape_cast %81 : vector<1x8x16xf32> to vector<8x16xf32>
    %83 = tpu.concatenate %76, %78, %80, %82 in 1 : vector<8x16xf32>, vector<8x16xf32>, vector<8x16xf32>, vector<8x16xf32> -> vector<8x64xf32>
    %c0_23 = arith.constant 0 : index
    %c0_24 = arith.constant 0 : index
    %c0_25 = arith.constant 0 : index
    %84 = vector.load %arg7[%c0_23, %c0_24, %c0_25] : memref<1x64x64xf32, #tpu.memory_space<vmem>>, vector<1x64x64xf32>
    %85 = vector.shape_cast %84 : vector<1x64x64xf32> to vector<64x64xf32>
    %cst_26 = arith.constant dense<0.000000e+00> : vector<8x64xf32>
    %86 = tpu.matmul %83, %85, %cst_26 {dimension_numbers = #tpu.dot_dimension_numbers<[1], [0], [0], [1], [0, 0, 1, 1], [], []>} : vector<8x64xf32>, vector<64x64xf32>, vector<8x64xf32> -> vector<8x64xf32>
    %c0_27 = arith.constant 0 : index
    %c0_28 = arith.constant 0 : index
    %c0_29 = arith.constant 0 : index
    %87 = vector.load %arg8[%c0_27, %c0_28, %c0_29] : memref<1x1x64xf32, #tpu.memory_space<vmem>>, vector<1x1x64xf32>
    %88 = vector.shape_cast %87 : vector<1x1x64xf32> to vector<1x64xf32>
    %89 = vector.broadcast %88 : vector<1x64xf32> to vector<8x64xf32>
    %90 = arith.addf %86, %89 : vector<8x64xf32>
    %91 = arith.addf %3, %90 : vector<8x64xf32>
    %c0_30 = arith.constant 0 : index
    %c0_31 = arith.constant 0 : index
    %c0_32 = arith.constant 0 : index
    %92 = vector.load %arg9[%c0_30, %c0_31, %c0_32] : memref<1x1x64xf32, #tpu.memory_space<vmem>>, vector<1x1x64xf32>
    %93 = vector.shape_cast %92 : vector<1x1x64xf32> to vector<1x64xf32>
    %c0_33 = arith.constant 0 : index
    %c0_34 = arith.constant 0 : index
    %c0_35 = arith.constant 0 : index
    %94 = vector.load %arg10[%c0_33, %c0_34, %c0_35] : memref<1x1x64xf32, #tpu.memory_space<vmem>>, vector<1x1x64xf32>
    %95 = vector.shape_cast %94 : vector<1x1x64xf32> to vector<1x64xf32>
    %cst_36 = arith.constant dense<0.000000e+00> : vector<8xf32>
    %96 = vector.multi_reduction <add>, %91, %cst_36 [1] : vector<8x64xf32> to vector<8xf32>
    %97 = vector.shape_cast %96 : vector<8xf32> to vector<8x1xf32>
    %cst_37 = arith.constant 6.400000e+01 : f32
    %98 = vector.broadcast %cst_37 : f32 to vector<8x1xf32>
    %99 = arith.divf %97, %98 : vector<8x1xf32>
    %100 = vector.broadcast %99 : vector<8x1xf32> to vector<8x64xf32>
    %101 = arith.subf %91, %100 : vector<8x64xf32>
    %102 = arith.mulf %101, %101 : vector<8x64xf32>
    %cst_38 = arith.constant dense<0.000000e+00> : vector<8xf32>
    %103 = vector.multi_reduction <add>, %102, %cst_38 [1] : vector<8x64xf32> to vector<8xf32>
    %104 = vector.shape_cast %103 : vector<8xf32> to vector<8x1xf32>
    %cst_39 = arith.constant 6.400000e+01 : f32
    %105 = vector.broadcast %cst_39 : f32 to vector<8x1xf32>
    %106 = arith.divf %104, %105 : vector<8x1xf32>
    %107 = vector.broadcast %99 : vector<8x1xf32> to vector<8x64xf32>
    %108 = arith.subf %91, %107 : vector<8x64xf32>
    %cst_40 = arith.constant 9.99999997E-7 : f32
    %109 = vector.broadcast %cst_40 : f32 to vector<8x1xf32>
    %110 = arith.addf %106, %109 : vector<8x1xf32>
    %111 = math.rsqrt %110 : vector<8x1xf32>
    %112 = vector.broadcast %111 : vector<8x1xf32> to vector<8x64xf32>
    %113 = arith.mulf %108, %112 : vector<8x64xf32>
    %114 = vector.broadcast %93 : vector<1x64xf32> to vector<8x64xf32>
    %115 = arith.mulf %113, %114 : vector<8x64xf32>
    %116 = vector.broadcast %95 : vector<1x64xf32> to vector<8x64xf32>
    %117 = arith.addf %115, %116 : vector<8x64xf32>
    %c0_41 = arith.constant 0 : index
    %c0_42 = arith.constant 0 : index
    %c0_43 = arith.constant 0 : index
    %118 = vector.load %arg11[%c0_41, %c0_42, %c0_43] : memref<1x64x256xf32, #tpu.memory_space<vmem>>, vector<1x64x256xf32>
    %119 = vector.shape_cast %118 : vector<1x64x256xf32> to vector<64x256xf32>
    %cst_44 = arith.constant dense<0.000000e+00> : vector<8x256xf32>
    %120 = tpu.matmul %117, %119, %cst_44 {dimension_numbers = #tpu.dot_dimension_numbers<[1], [0], [0], [1], [0, 0, 1, 1], [], []>} : vector<8x64xf32>, vector<64x256xf32>, vector<8x256xf32> -> vector<8x256xf32>
    %c0_45 = arith.constant 0 : index
    %c0_46 = arith.constant 0 : index
    %c0_47 = arith.constant 0 : index
    %121 = vector.load %arg12[%c0_45, %c0_46, %c0_47] : memref<1x1x256xf32, #tpu.memory_space<vmem>>, vector<1x1x256xf32>
    %122 = vector.shape_cast %121 : vector<1x1x256xf32> to vector<1x256xf32>
    %123 = vector.broadcast %122 : vector<1x256xf32> to vector<8x256xf32>
    %124 = arith.addf %120, %123 : vector<8x256xf32>
    %cst_48 = arith.constant 5.000000e-01 : f32
    %125 = vector.broadcast %cst_48 : f32 to vector<8x256xf32>
    %126 = arith.mulf %125, %124 : vector<8x256xf32>
    %cst_49 = arith.constant 0.707106769 : f32
    %127 = vector.broadcast %cst_49 : f32 to vector<8x256xf32>
    %128 = arith.mulf %124, %127 : vector<8x256xf32>
    %129 = math.absf %128 : vector<8x256xf32>
    %cst_50 = arith.constant 0.327591091 : f32
    %130 = vector.broadcast %cst_50 : f32 to vector<8x256xf32>
    %131 = arith.mulf %130, %129 : vector<8x256xf32>
    %cst_51 = arith.constant 1.000000e+00 : f32
    %132 = vector.broadcast %cst_51 : f32 to vector<8x256xf32>
    %133 = arith.addf %132, %131 : vector<8x256xf32>
    %134 = tpu.reciprocal %133 {approx = true} : vector<8x256xf32> -> vector<8x256xf32>
    %cst_52 = arith.constant 1.06140542 : f32
    %135 = vector.broadcast %cst_52 : f32 to vector<8x256xf32>
    %136 = arith.mulf %135, %134 : vector<8x256xf32>
    %cst_53 = arith.constant -1.45315206 : f32
    %137 = vector.broadcast %cst_53 : f32 to vector<8x256xf32>
    %138 = arith.addf %136, %137 : vector<8x256xf32>
    %139 = arith.mulf %138, %134 : vector<8x256xf32>
    %cst_54 = arith.constant 1.42141378 : f32
    %140 = vector.broadcast %cst_54 : f32 to vector<8x256xf32>
    %141 = arith.addf %139, %140 : vector<8x256xf32>
    %142 = arith.mulf %141, %134 : vector<8x256xf32>
    %cst_55 = arith.constant -0.284496725 : f32
    %143 = vector.broadcast %cst_55 : f32 to vector<8x256xf32>
    %144 = arith.addf %142, %143 : vector<8x256xf32>
    %145 = arith.mulf %144, %134 : vector<8x256xf32>
    %cst_56 = arith.constant 0.254829586 : f32
    %146 = vector.broadcast %cst_56 : f32 to vector<8x256xf32>
    %147 = arith.addf %145, %146 : vector<8x256xf32>
    %148 = arith.mulf %147, %134 : vector<8x256xf32>
    %cst_57 = arith.constant 0.000000e+00 : f32
    %149 = vector.broadcast %cst_57 : f32 to vector<8x256xf32>
    %150 = arith.subf %149, %129 : vector<8x256xf32>
    %151 = arith.mulf %150, %129 : vector<8x256xf32>
    %152 = math.exp %151 : vector<8x256xf32>
    %153 = arith.mulf %148, %152 : vector<8x256xf32>
    %cst_58 = arith.constant 1.000000e+00 : f32
    %154 = vector.broadcast %cst_58 : f32 to vector<8x256xf32>
    %155 = arith.subf %154, %153 : vector<8x256xf32>
    %cst_59 = arith.constant 0.000000e+00 : f32
    %156 = vector.broadcast %cst_59 : f32 to vector<8x256xf32>
    %157 = arith.cmpf oge, %128, %156 : vector<8x256xf32>
    %cst_60 = arith.constant 0.000000e+00 : f32
    %158 = vector.broadcast %cst_60 : f32 to vector<8x256xf32>
    %159 = arith.subf %158, %155 : vector<8x256xf32>
    %160 = arith.select %157, %155, %159 : vector<8x256xi1>, vector<8x256xf32>
    %cst_61 = arith.constant 1.000000e+00 : f32
    %161 = vector.broadcast %cst_61 : f32 to vector<8x256xf32>
    %162 = arith.addf %161, %160 : vector<8x256xf32>
    %163 = arith.mulf %126, %162 : vector<8x256xf32>
    %c0_62 = arith.constant 0 : index
    %c0_63 = arith.constant 0 : index
    %c0_64 = arith.constant 0 : index
    %164 = vector.load %arg13[%c0_62, %c0_63, %c0_64] : memref<1x256x64xf32, #tpu.memory_space<vmem>>, vector<1x256x64xf32>
    %165 = vector.shape_cast %164 : vector<1x256x64xf32> to vector<256x64xf32>
    %cst_65 = arith.constant dense<0.000000e+00> : vector<8x64xf32>
    %166 = tpu.matmul %163, %165, %cst_65 {dimension_numbers = #tpu.dot_dimension_numbers<[1], [0], [0], [1], [0, 0, 1, 1], [], []>} : vector<8x256xf32>, vector<256x64xf32>, vector<8x64xf32> -> vector<8x64xf32>
    %c0_66 = arith.constant 0 : index
    %c0_67 = arith.constant 0 : index
    %c0_68 = arith.constant 0 : index
    %167 = vector.load %arg14[%c0_66, %c0_67, %c0_68] : memref<1x1x64xf32, #tpu.memory_space<vmem>>, vector<1x1x64xf32>
    %168 = vector.shape_cast %167 : vector<1x1x64xf32> to vector<1x64xf32>
    %169 = vector.broadcast %168 : vector<1x64xf32> to vector<8x64xf32>
    %170 = arith.addf %166, %169 : vector<8x64xf32>
    %171 = arith.addf %91, %170 : vector<8x64xf32>
    %c0_69 = arith.constant 0 : index
    %c0_70 = arith.constant 0 : index
    %172 = vector.load %arg18[%c0_69, %c0_70] : memref<8x64xf32, #tpu.memory_space<vmem>>, vector<8x64xf32>
    tpu.vector_store %arg18[%c0_69, %c0_70], %171 {strides = array<i32>} : memref<8x64xf32, #tpu.memory_space<vmem>>, vector<8x64xf32>,
    %c1_i32 = arith.constant 1 : i32
    %173 = arith.cmpi eq, %arg1, %c1_i32 : i32
    %174 = arith.extui %173 : i1 to i32
    %c0_i32_71 = arith.constant 0 : i32
    %175 = arith.cmpi ne, %174, %c0_i32_71 : i32
    scf.if %175 {
      %c0_72 = arith.constant 0 : index
      %c0_73 = arith.constant 0 : index
      %176 = vector.load %arg15[%c0_72, %c0_73] : memref<1x64xf32, #tpu.memory_space<vmem>>, vector<1x64xf32>
      %c0_74 = arith.constant 0 : index
      %c0_75 = arith.constant 0 : index
      %177 = vector.load %arg16[%c0_74, %c0_75] : memref<1x64xf32, #tpu.memory_space<vmem>>, vector<1x64xf32>
      %cst_76 = arith.constant dense<0.000000e+00> : vector<8xf32>
      %178 = vector.multi_reduction <add>, %171, %cst_76 [1] : vector<8x64xf32> to vector<8xf32>
      %179 = vector.shape_cast %178 : vector<8xf32> to vector<8x1xf32>
      %cst_77 = arith.constant 6.400000e+01 : f32
      %180 = vector.broadcast %cst_77 : f32 to vector<8x1xf32>
      %181 = arith.divf %179, %180 : vector<8x1xf32>
      %182 = vector.broadcast %181 : vector<8x1xf32> to vector<8x64xf32>
      %183 = arith.subf %171, %182 : vector<8x64xf32>
      %184 = arith.mulf %183, %183 : vector<8x64xf32>
      %cst_78 = arith.constant dense<0.000000e+00> : vector<8xf32>
      %185 = vector.multi_reduction <add>, %184, %cst_78 [1] : vector<8x64xf32> to vector<8xf32>
      %186 = vector.shape_cast %185 : vector<8xf32> to vector<8x1xf32>
      %cst_79 = arith.constant 6.400000e+01 : f32
      %187 = vector.broadcast %cst_79 : f32 to vector<8x1xf32>
      %188 = arith.divf %186, %187 : vector<8x1xf32>
      %189 = vector.broadcast %181 : vector<8x1xf32> to vector<8x64xf32>
      %190 = arith.subf %171, %189 : vector<8x64xf32>
      %cst_80 = arith.constant 9.99999997E-7 : f32
      %191 = vector.broadcast %cst_80 : f32 to vector<8x1xf32>
      %192 = arith.addf %188, %191 : vector<8x1xf32>
      %193 = math.rsqrt %192 : vector<8x1xf32>
      %194 = vector.broadcast %193 : vector<8x1xf32> to vector<8x64xf32>
      %195 = arith.mulf %190, %194 : vector<8x64xf32>
      %196 = vector.broadcast %176 : vector<1x64xf32> to vector<8x64xf32>
      %197 = arith.mulf %195, %196 : vector<8x64xf32>
      %198 = vector.broadcast %177 : vector<1x64xf32> to vector<8x64xf32>
      %199 = arith.addf %197, %198 : vector<8x64xf32>
      %c0_81 = arith.constant 0 : index
      %c0_82 = arith.constant 0 : index
      %c0_83 = arith.constant 0 : index
      %200 = vector.load %arg17[%c0_81, %c0_82, %c0_83] : memref<1x8x64xf32, #tpu.memory_space<vmem>>, vector<1x8x64xf32>
      %201 = vector.shape_cast %200 : vector<1x8x64xf32> to vector<8x64xf32>
      %202 = vector.shape_cast %199 : vector<8x64xf32> to vector<1x8x64xf32>
      tpu.vector_store %arg17[%c0_81, %c0_82, %c0_83], %202 {strides = array<i32>} : memref<1x8x64xf32, #tpu.memory_space<vmem>>, vector<1x8x64xf32>,
    } else {
    }
    return
  }
  func.func @transform_0(%arg0: i32, %arg1: i32) -> (i32, i32, i32) {
    %c0_i32 = arith.constant 0 : i32
    %c0_i32_0 = arith.constant 0 : i32
    %c0_i32_1 = arith.constant 0 : i32
    return %arg0, %c0_i32, %c0_i32_0 : i32, i32, i32
  }
  func.func @transform_1(%arg0: i32, %arg1: i32) -> (i32, i32, i32) {
    %c0_i32 = arith.constant 0 : i32
    %c0_i32_0 = arith.constant 0 : i32
    %c0_i32_1 = arith.constant 0 : i32
    return %arg1, %c0_i32, %c0_i32_0 : i32, i32, i32
  }
  func.func @transform_2(%arg0: i32, %arg1: i32) -> (i32, i32, i32) {
    %c0_i32 = arith.constant 0 : i32
    %c0_i32_0 = arith.constant 0 : i32
    %c0_i32_1 = arith.constant 0 : i32
    return %arg1, %c0_i32, %c0_i32_0 : i32, i32, i32
  }
  func.func @transform_3(%arg0: i32, %arg1: i32) -> (i32, i32, i32) {
    %c0_i32 = arith.constant 0 : i32
    %c0_i32_0 = arith.constant 0 : i32
    %c0_i32_1 = arith.constant 0 : i32
    return %arg1, %c0_i32, %c0_i32_0 : i32, i32, i32
  }
  func.func @transform_4(%arg0: i32, %arg1: i32) -> (i32, i32, i32) {
    %c0_i32 = arith.constant 0 : i32
    %c0_i32_0 = arith.constant 0 : i32
    %c0_i32_1 = arith.constant 0 : i32
    return %arg1, %c0_i32, %c0_i32_0 : i32, i32, i32
  }
  func.func @transform_5(%arg0: i32, %arg1: i32) -> (i32, i32, i32) {
    %c0_i32 = arith.constant 0 : i32
    %c0_i32_0 = arith.constant 0 : i32
    %c0_i32_1 = arith.constant 0 : i32
    return %arg1, %c0_i32, %c0_i32_0 : i32, i32, i32
  }
  func.func @transform_6(%arg0: i32, %arg1: i32) -> (i32, i32, i32) {
    %c0_i32 = arith.constant 0 : i32
    %c0_i32_0 = arith.constant 0 : i32
    %c0_i32_1 = arith.constant 0 : i32
    return %arg1, %c0_i32, %c0_i32_0 : i32, i32, i32
  }
  func.func @transform_7(%arg0: i32, %arg1: i32) -> (i32, i32, i32) {
    %c0_i32 = arith.constant 0 : i32
    %c0_i32_0 = arith.constant 0 : i32
    %c0_i32_1 = arith.constant 0 : i32
    return %arg1, %c0_i32, %c0_i32_0 : i32, i32, i32
  }
  func.func @transform_8(%arg0: i32, %arg1: i32) -> (i32, i32, i32) {
    %c0_i32 = arith.constant 0 : i32
    %c0_i32_0 = arith.constant 0 : i32
    %c0_i32_1 = arith.constant 0 : i32
    return %arg1, %c0_i32, %c0_i32_0 : i32, i32, i32
  }
  func.func @transform_9(%arg0: i32, %arg1: i32) -> (i32, i32, i32) {
    %c0_i32 = arith.constant 0 : i32
    %c0_i32_0 = arith.constant 0 : i32
    %c0_i32_1 = arith.constant 0 : i32
    return %arg1, %c0_i32, %c0_i32_0 : i32, i32, i32
  }
  func.func @transform_10(%arg0: i32, %arg1: i32) -> (i32, i32, i32) {
    %c0_i32 = arith.constant 0 : i32
    %c0_i32_0 = arith.constant 0 : i32
    %c0_i32_1 = arith.constant 0 : i32
    return %arg1, %c0_i32, %c0_i32_0 : i32, i32, i32
  }
  func.func @transform_11(%arg0: i32, %arg1: i32) -> (i32, i32, i32) {
    %c0_i32 = arith.constant 0 : i32
    %c0_i32_0 = arith.constant 0 : i32
    %c0_i32_1 = arith.constant 0 : i32
    return %arg1, %c0_i32, %c0_i32_0 : i32, i32, i32
  }
  func.func @transform_12(%arg0: i32, %arg1: i32) -> (i32, i32, i32) {
    %c0_i32 = arith.constant 0 : i32
    %c0_i32_0 = arith.constant 0 : i32
    %c0_i32_1 = arith.constant 0 : i32
    return %arg1, %c0_i32, %c0_i32_0 : i32, i32, i32
  }
  func.func @transform_13(%arg0: i32, %arg1: i32) -> (i32, i32) {
    %c0_i32 = arith.constant 0 : i32
    %c0_i32_0 = arith.constant 0 : i32
    %c0_i32_1 = arith.constant 0 : i32
    return %c0_i32, %c0_i32_0 : i32, i32
  }
  func.func @transform_14(%arg0: i32, %arg1: i32) -> (i32, i32) {
    %c0_i32 = arith.constant 0 : i32
    %c0_i32_0 = arith.constant 0 : i32
    %c0_i32_1 = arith.constant 0 : i32
    return %c0_i32, %c0_i32_0 : i32, i32
  }
  func.func @transform_15(%arg0: i32, %arg1: i32) -> (i32, i32, i32) {
    %c0_i32 = arith.constant 0 : i32
    %c0_i32_0 = arith.constant 0 : i32
    %c0_i32_1 = arith.constant 0 : i32
    return %arg0, %c0_i32, %c0_i32_0 : i32, i32, i32
  }
}

</mosaic_0001>

<bundles_post_ra>
// kernel: tpu_custom_call.1
= control target key start
LH: loop header
LB: loop body
LE: loop exit
PB: predicated region body
PF: predicated region fallthrough
CT: control target
= control target key end

     0   :  { %s3013_s0 = inlined_call_operand.vmem [shape: f32[2,8,64], index: 0, kind: input, shape index: {}]   ;;  %s3014_s1 = inlined_call_operand.vmem [shape: f32[2,1,64], index: 1, kind: input, shape index: {}]   ;;  %s3015_s2 = inlined_call_operand.vmem [shape: f32[2,1,64], index: 2, kind: input, shape index: {}]   ;;  %s3016_s3 = inlined_call_operand.vmem [shape: f32[2,64,192], index: 3, kind: input, shape index: {}]   ;;  %s3017_s4 = inlined_call_operand.vmem [shape: f32[2,1,192], index: 4, kind: input, shape index: {}]   ;;  %s3018_s5 = inlined_call_operand.vmem [shape: f32[2,64,64], index: 5, kind: input, shape index: {}]   ;;  %s3019_s6 = inlined_call_operand.vmem [shape: f32[2,1,64], index: 6, kind: input, shape index: {}]   ;;  %s3020_s7 = inlined_call_operand.vmem [shape: f32[2,1,64], index: 7, kind: input, shape index: {}]   ;;  %s3021_s8 = inlined_call_operand.vmem [shape: f32[2,1,64], index: 8, kind: input, shape index: {}]   ;;  %s3022_s9 = inlined_call_operand.vmem [shape: f32[2,64,256], index: 9, kind: input, shape index: {}]   ;;  %s3023_s10 = inlined_call_operand.vmem [shape: f32[2,1,256], index: 10, kind: input, shape index: {}]   ;;  %s3024_s11 = inlined_call_operand.vmem [shape: f32[2,256,64], index: 11, kind: input, shape index: {}]   ;;  %s3025_s12 = inlined_call_operand.vmem [shape: f32[2,1,64], index: 12, kind: input, shape index: {}]   ;;  %s3026_s13 = inlined_call_operand.vmem [shape: f32[1,64], index: 13, kind: input, shape index: {}]   ;;  %s3027_s14 = inlined_call_operand.vmem [shape: f32[1,64], index: 14, kind: input, shape index: {}]   ;;  %s3028_s15 = inlined_call_operand.hbm [shape: f32[2,8,64], index: 15, kind: output, shape index: {}]  }
   0x1   :  { %3044 = sst [smem:[#allocation19_spill]] %s3013_s0 }
   0x2   :  { %3045 = sst [smem:[#allocation20_spill]] %s3014_s1 }
   0x3   :  { %3046 = sst [smem:[#allocation21_spill]] %s3015_s2 }
   0x4   :  { %3047 = sst [smem:[#allocation22_spill]] %s3016_s3 }
   0x5   :  { %3048 = sst [smem:[#allocation23_spill]] %s3017_s4 }
   0x6   :  { %3049 = sst [smem:[#allocation24_spill]] %s3026_s13 }
   0x7   :  { %3050 = sst [smem:[#allocation25_spill]] %s3027_s14 }
   0x8   :  { %3051 = sst [smem:[#allocation26_spill]] %s3028_s15 }
   0x9   :  { %20 = vsyncpa [#allocation4], 0 }
   0xa   :  { %22 = vsyncpa [#allocation4 + $0x1], 0  ;;  %s2607_s18 = smov 0   ;;  %s2609_s19 = smov 0  }
   0xb   :  { %s2611_s20 = smov 0   ;;  %s2613_s21 = smov 0  }
   0xc   :  { %s2615_s22 = smov 0   ;;  %s2617_s23 = smov 0  }
   0xd   :  { %s2619_s24 = smov 0   ;;  %s2621_s25 = smov 0  }
   0xe LB: > { %3052 = sst [smem:[#allocation6_spill]] %s2487_s18  ;;  %s2144_s26 = sadd.s32 4294967295, %s2515_s25   ;;  %s2515_s25 = sphi %s2621_s25, %s28_s25   ;;  %s2511_s24 = sphi %s2619_s24, %s3097_s24   ;;  %s2507_s23 = sphi %s2617_s23, %s3096_s23   ;;  %s2503_s22 = sphi %s2615_s22, %s3095_s22   ;;  %s2499_s21 = sphi %s2613_s21, %s3094_s21   ;;  %s2495_s20 = sphi %s2611_s20, %s3093_s20   ;;  %s2491_s19 = sphi %s2609_s19, %s3092_s19   ;;  %s2487_s18 = sphi %s2607_s18, %s3091_s18  }
   0xf   : > { %3053 = sst [smem:[#allocation7_spill]] %s2491_s19  ;;  %s2145_s27 = sadd.s32 4294967294, %s2515_s25  }
  0x10   : > { %3054 = sst [smem:[#allocation8_spill]] %s2495_s20  ;;  %s37_s28 = sadd.s32 1, %s2507_s23 }
  0x11   : > { %3055 = sst [smem:[#allocation9_spill]] %s2499_s21  ;;  %p38_p0 = scmp.ge.s32.totalorder %s37_s28, 2 }
  0x12   : > { %3056 = sst [smem:[#allocation10_spill]] %s2503_s22  ;;  %s40_s29 = sadd.s32 1, %s2511_s24 }
  0x13   : > { %3057 = sst [smem:[#allocation11_spill]] %s2507_s23  ;;  %p437_p1 = scmp.ne.s32.totalorder %s2495_s20, %s2491_s19 }
  0x14   : > { %3058 = sst [smem:[#allocation12_spill]] %s2511_s24  ;;  %p438_p2 = scmp.eq.s32.totalorder %s2144_s26, 3 }
  0x15   : > { %3059 = sst [smem:[#allocation13_spill]] %s2515_s25  ;;  %s3099_s28 = smov (%p38_p0, %s37_s28), 0 }
  0x16   : > { %3060 = sst [smem:[#allocation14_spill]] %s3099_s28  ;;  %s3101_s29 = smov (!%p38_p0, %s40_s29), %s2511_s24 }
  0x17   : > { %p2656_p3 = por %p438_p2, %p437_p1  ;;  %p443_p4 = scmp.ne.s32.totalorder %s2491_s19, %s2487_s18 }
  0x18   : > { %p42_p5 = scmp.ge.s32.totalorder %s3101_s29, 2  ;;  %p444_p6 = scmp.eq.s32.totalorder %s2145_s27, 3 }
  0x19   : > { %s3061_s30 = scalar_select %p2656_p3, 1, 0 }
  0x1a   : > { %p2148_p7 = scmp.ge.s32.totalorder %s2515_s25, 1  ;;  %p557_p8 = scmp.lt.s32.totalorder %s2515_s25, 5 }
  0x1b   : > { %3062 = sst [smem:[#allocation15_spill]] %s3061_s30  ;;  %s3103_s29 = smov (%p42_p5, %s3101_s29), 0 }
  0x1c   : > { %3063 = sst [smem:[#allocation16_spill]] %s3103_s29  ;;  %p2666_p9 = por %p444_p6, %p443_p4 }
  0x1d   : > { %p558_p10 = pnand %p2148_p7, %p557_p8  ;;  %s424_s17 = ssub.s32 %s2511_s24, %s3103_s29 }
  0x1e   : > { %s3064_s16 = scalar_select %p2666_p9, 1, 0 }
  0x1f   : > { %s427_s26 = sadd.s32 1, %s2495_s20  ;;  %p425_p11 = scmp.eq.s32.totalorder %s424_s17, 0 }
  0x20   : > { %3065 = sst [smem:[#allocation17_spill]] %s3064_s16  ;;  %561 = sbr.rel (%p558_p10) target bundleno = 2916 (0xb64), region = 80 }
  0x21   : > { %s2674_s28 = scalar_select %p425_p11, %s2495_s20, %s427_s26  }
  0x22   : > { %s3033_s27 = sand.u32 (!%p558_p10), 1, %s2491_s19   ;;  %p650_p12 = scmp.lt.s32.totalorder (!%p558_p10), %s2503_s22, 1 }
  0x23   : > { %3066 = sst [smem:[#allocation18_spill]] %s2674_s28  ;;  %s2680_s23 = sshll.u32 (!%p558_p10), %s3033_s27, 3 }
  0x24   : > { %p654_p13 = scmp.lt.s32.totalorder (!%p558_p10), %s2499_s21, 1  ;;  %s3067_s0 = sld [smem:[#allocation19_spill]] (!%p558_p10) }
  0x25   : > { %s651_s16 = scalar_select %p650_p12, %s2503_s22, 1 }
  0x26   : > { %s2685_s18 = scalar_select %p654_p13, %s2499_s21, 1 }
  0x27   : > { %s2150_s17 = sshll.u32 %s651_s16, 3  ;;  %s3070_s3 = sld [smem:[#allocation22_spill]] }
  0x28   : > { %s2190_s19 = sshll.u32 %s2685_s18, 7  ;;  %s2153_s16 = sshll.u32 %s2685_s18, 1 }
  0x29   : > { %s3071_s4 = sld [smem:[#allocation23_spill]]  ;;  %s2191_s26 = sshll.u32 %s2685_s18, 6 }
  0x2a   : > { %s653_s27 = scalar_lea.vmem %s3067_s0, %s2150_s17  ;;  %s2714_s20 = scalar_lea.vmem %s3018_s5, %s2191_s26 }
  0x2b   : > { %s2731_s1 = scalar_lea.vmem %s3022_s9, %s2190_s19  ;;  %s2736_s28 = scalar_lea.vmem %s3023_s10, %s2153_s16 }
  0x2c   : > { %s2193_s15 = sshll.u32 %s2685_s18, 8  ;;  %s699_s0 = scalar_lea.vmem %s3025_s12, %s2685_s18 }
  0x2d   : > { %s2702_s13 = scalar_lea.vmem %s3070_s3, %s2190_s19  ;;  %s2746_s2 = scalar_lea.vmem %s3024_s11, %s2193_s15 }
  0x2e   : > { %s649_s3 = scalar_lea.vmem [#allocation3], %s2680_s23  ;;  %s3072_s21 = sld [smem:[#allocation9_spill]] }
  0x2f   : > { %s2708_s17 = scalar_lea.vmem %s3071_s4, %s2153_s16 }
  0x34   : > { %p2161_p0 = scmp.ne.s32.totalorder %s3072_s21, 0 }
  0x36   : > { %703 = sbr.rel (%p2161_p0) target bundleno = 61 (0x3d), region = 84 }
  0x3b   : > { %v704_v0 = vld [vmem:[%s653_s27] sm:$0xff]  ;;  %vm705_vm0 = vcmask 523264  }
  0x3c   : > { %706 = vst.msk [vmem:[#allocation2] sm:$0xff] %vm705_vm0, %v704_v0 }
  0x3d PF: > { %vm710_vm1 = vcmask 523264   ;;  %v754_v8 = vld [vmem:[%s2702_s13 + $0x78] sm:$0xff]  ;;  %v753_v9 = vld [vmem:[%s2702_s13 + $0x70] sm:$0xff]  ;;  %v752_v10 = vld [vmem:[%s2702_s13 + $0x68] sm:$0xff]  ;;  %v2517_v12 = vmov 0.0   ;;  %s3073_s30 = sld [smem:[#allocation20_spill]]  ;;  %v757_v34 = vlaneseq  ;;  %s3077_s19 = scalar_lea.vmem %s3019_s6, %s2685_s18 }
  0x3e   : > { %786 = vmatprep.subr.mxu1 %v754_v8  ;;  %v751_v11 = vld [vmem:[%s2702_s13 + $0x60] sm:$0xff]  ;;  %834 = vmatprep.mubr.f32.mxu1 %v2517_v12  ;;  %v750_v13 = vld [vmem:[%s2702_s13 + $0x58] sm:$0xff]  ;;  %v749_v14 = vld [vmem:[%s2702_s13 + $0x50] sm:$0xff]  ;;  %vm2518_vm2 = vmmov 0   ;;  %s2520_s29 = smov 112   ;;  %s2521_s24 = smov 96  }
  0x3f   : > { %787 = vmatpush1.msra.mxu1 %v753_v9  ;;  %2274 = vmatprep.subr.mxu0 %v2517_v12  ;;  %v748_v15 = vld [vmem:[%s2702_s13 + $0x48] sm:$0xff]  ;;  %v747_v16 = vld [vmem:[%s2702_s13 + $0x40] sm:$0xff]  ;;  %v746_v17 = vld [vmem:[%s2702_s13 + $0x38] sm:$0xff]  ;;  %v2786_v35 = vshrl.u32 %v757_v34, 7  ;;  %s2522_s26 = smov 64   ;;  %vm860_vm3 = vcmask 130048   ;;  %s3078_s16 = scalar_lea.vmem %s3020_s7, %s2685_s18 }
  0x40   : > { %788 = vmatprep.subr.mxu1 %v752_v10  ;;  %v745_v18 = vld [vmem:[%s2702_s13 + $0x30] sm:$0xff]  ;;  %v744_v19 = vld [vmem:[%s2702_s13 + $0x28] sm:$0xff]  ;;  %v743_v20 = vld [vmem:[%s2702_s13 + $0x20] sm:$0xff]  ;;  %2276 = vmatprep.mubr.msk.f32.mxu0 %vm2518_vm2, %v2517_v12  ;;  %vm1163_vm4 = vcmask 64512   ;;  %s2523_s15 = smov 16   ;;  %s2524_s25 = smov 32  }
  0x41   : > { %789 = vmatpush1.msra.mxu1 %v751_v11  ;;  %v742_v21 = vld [vmem:[%s2702_s13 + $0x18] sm:$0xff]  ;;  %v741_v22 = vld [vmem:[%s2702_s13 + $0x10] sm:$0xff]  ;;  %v740_v23 = vld [vmem:[%s2702_s13 + $0x8] sm:$0xff]  ;;  %v759_v36 = vsub.s32 0, %v2786_v35  ;;  %v763_v38 = vsub.s32 1, %v2786_v35  ;;  %s2525_s14 = smov 48  }
  0x42   : > { %790 = vmatprep.subr.mxu1 %v750_v13  ;;  %v739_v24 = vld [vmem:[%s2702_s13] sm:$0xff]  ;;  %s3075_s13 = sld [smem:[#allocation21_spill]]  ;;  %vm1513_vm5 = vcmask 261120   ;;  %vm1515_vm6 = vcmask 392192  }
  0x43   : > { %v2750_v1 = vld [vmem:[#allocation2] sm:$0xff]  ;;  %791 = vmatpush1.msra.mxu1 %v749_v14  ;;  %s3074_s27 = scalar_lea.vmem %s3073_s30, %s2685_s18 }
  0x44   : > { %v711_v2 = vsel %vm710_vm1, %v2750_v1, 0.0  ;;  %792 = vmatprep.subr.mxu1 %v748_v15  ;;  %v2162_v29 = vld [vmem:[%s3074_s27] ss:$0 sm:$0xff] }
  0x45   : > { %712 = vadd.xlane.f32.xlu0 %v711_v2  ;;  %793 = vmatpush1.msra.mxu1 %v747_v16  ;;  %v755_v37 = vld [vmem:[%s2708_s17] sm:$0x3]  ;;  %s2519_s17 = smov 80  }
  0x46   : > { %794 = vmatprep.subr.mxu1 %v746_v17  ;;  %v760_v39 = vrot.slane %v755_v37, %v759_v36  ;;  %v764_v40 = vrot.slane %v755_v37, %v763_v38 }
  0x47   : > { %795 = vmatpush1.msra.mxu1 %v745_v18 }
  0x48   : > { %796 = vmatprep.subr.mxu1 %v744_v19  ;;  %s3076_s21 = scalar_lea.vmem %s3075_s13, %s2685_s18  ;;  %s3079_s13 = scalar_lea.vmem %s3021_s8, %s2685_s18 }
  0x49   : > { %797 = vmatpush1.msra.mxu1 %v743_v20  ;;  %v2163_v31 = vld [vmem:[%s3076_s21] ss:$0 sm:$0xff]  ;;  %s3080_s21 = sld [smem:[#allocation9_spill]] }
  0x4a   : > { %798 = vmatprep.subr.mxu1 %v742_v21 }
  0x4b   : > { %799 = vmatpush1.msra.mxu1 %v741_v22 }
  0x4c   : > { %800 = vmatprep.subr.mxu1 %v740_v23 }
  0x4d   : > { %801 = vmatpush1.msra.mxu1 %v739_v24 }
  0x4e   : > { %2254 = vmatprep.subr.mxu1 %v2517_v12 }
  0x4f   : > { %p2183_p1 = scmp.ne.s32.totalorder %s3080_s21, 1 }
  0xce   : > { %v713_v3 = vpop.xlane.xlu0 %712 }
  0xcf   : > { %v715_v4 = vmul.f32 0.015625, %v713_v3 }
  0xd1   : > { %v716_v5 = vsub.f32 %v2750_v1, %v715_v4 }
  0xd3   : > { %v717_v6 = vmul.f32 %v716_v5, %v716_v5 }
  0xd5   : > { %v718_v7 = vsel %vm710_vm1, %v717_v6, 0.0 }
  0xd6   : > { %719 = vadd.xlane.f32.xlu0 %v718_v7 }
 0x15f   : > { %v720_v25 = vpop.xlane.xlu0 %719 }
 0x160   : > { %v721_v26 = vmul.f32 0.015625, %v720_v25 }
 0x162   : > { %v722_v27 = vadd.f32 1e-06, %v721_v26 }
 0x164   : > { %2393 = vrsqrt.f32 %v722_v27 }
 0x171   : > { %v2394_v28 = vpop.eup %2393 }
 0x172   : > { %v724_v30 = vmul.f32 %v2394_v28, %v716_v5 }
 0x174   : > { %v731_v32 = vmul.f32 %v2162_v29, %v724_v30 }
 0x176   : > { %v738_v33 = vadd.f32 %v2163_v31, %v731_v32 }
 0x178   : > { %2164 = vmatmul.mubr.msk.f32.vlgmr.msra.gmra.mxu1 %vm710_vm1, %v738_v33 }
 0x179   : > { %2256 = vmatprep.mubr.msk.f32.mxu1 %vm2518_vm2, %v2517_v12 }
 0x238   : > { %v836_v41 = vpop.f32.mrf.mxu1 }
 0x239   : > { %v837_v42 = vadd.f32 %v836_v41, %v760_v39  ;;  %v1523_v41 = vld [vmem:[%s2714_s20 + $0x30] sm:$0xff] }
 0x23a   : > { %v838_v43 = vpop.f32.mrf.mxu1 }
 0x23b   : > { %v2799_v44 = vadd.f32 %v838_v43, %v764_v40  ;;  %846 = vrot.lane.b32.xlu0 %v837_v42, %s2519_s17  ;;  %842 = vrot.lane.b32.xlu1 %v837_v42, %s2520_s29  ;;  %v1524_v40 = vld [vmem:[%s2714_s20 + $0x38] sm:$0xff] }
 0x23d   : > { %2275 = vmatpush3.msra.mxu0 %v2799_v44 }
 0x23e   : > { %2284 = vmatprep.subr.mxu0 %v2517_v12 }
 0x23f   : > { %844 = vrot.lane.b32.xlu1 %v837_v42, %s2521_s24 }
 0x243   : > { %858 = vrot.lane.b32.xlu1 %v837_v42, %s2522_s26 }
 0x2ad   : > { %v843_v45 = vpop.permute.xlu1 %842  ;;  %v847_v47 = vpop.permute.xlu0 %846 }
 0x2ae   : > { %935 = vrot.lane.b32.xlu1 %v843_v45, %s2522_s26 }
 0x2b1   : > { %v845_v46 = vpop.permute.xlu1 %844 }
 0x2b2   : > { %1011 = vrot.lane.b32.xlu1 %v845_v46, %s2522_s26 }
 0x2b5   : > { %v859_v48 = vpop.permute.xlu1 %858 }
 0x2b6   : > { %1087 = vrot.lane.b32.xlu1 %v847_v47, %s2522_s26  ;;  %2255 = vmatpush3.xpose.msk.msra.mxu1 %vm860_vm3, %v859_v48  ;;  %v1518_v48 = vld [vmem:[%s2714_s20 + $0x8] sm:$0xff]  ;;  %s3082_s26 = sld [smem:[#allocation25_spill]] (!%p2183_p1) }
 0x2b7   : > { %2259 = vmatprep.subr.mxu1 %v2517_v12 }
 0x2b9   : > { %2257 = vmatmul.mubr.msk.f32.vlgmr.msra.gmra.mxu1 %vm860_vm3, %v837_v42  ;;  %v1522_v42 = vld [vmem:[%s2714_s20 + $0x28] sm:$0xff] }
 0x2ba   : > { %2261 = vmatprep.mubr.msk.f32.mxu1 %vm2518_vm2, %v2517_v12 }
 0x320   : > { %v936_v49 = vpop.permute.xlu1 %935 }
 0x321   : > { %2260 = vmatpush3.xpose.msk.msra.mxu1 %vm860_vm3, %v936_v49  ;;  %v1517_v49 = vld [vmem:[%s2714_s20] sm:$0xff] }
 0x322   : > { %2264 = vmatprep.subr.mxu1 %v2517_v12 }
 0x324   : > { %2262 = vmatmul.mubr.msk.f32.vlgmr.msra.gmra.mxu1 %vm860_vm3, %v843_v45  ;;  %v1012_v50 = vpop.permute.xlu1 %1011  ;;  %v1521_v45 = vld [vmem:[%s2714_s20 + $0x20] sm:$0xff] }
 0x325   : > { %2265 = vmatpush3.xpose.msk.msra.mxu1 %vm860_vm3, %v1012_v50  ;;  %2266 = vmatprep.mubr.msk.f32.mxu1 %vm2518_vm2, %v2517_v12 }
 0x326   : > { %2269 = vmatprep.subr.mxu1 %v2517_v12 }
 0x328   : > { %2267 = vmatmul.mubr.msk.f32.vlgmr.msra.gmra.mxu1 %vm860_vm3, %v845_v46  ;;  %v1088_v51 = vpop.permute.xlu1 %1087  ;;  %v1520_v46 = vld [vmem:[%s2714_s20 + $0x18] sm:$0xff] }
 0x329   : > { %2270 = vmatpush3.xpose.msk.msra.mxu1 %vm860_vm3, %v1088_v51  ;;  %2271 = vmatprep.mubr.msk.f32.mxu1 %vm2518_vm2, %v2517_v12 }
 0x32a   : > { %2279 = vmatprep.subr.mxu1 %v2517_v12 }
 0x32c   : > { %2272 = vmatmul.mubr.msk.f32.vlgmr.msra.gmra.mxu1 %vm860_vm3, %v847_v47  ;;  %v1519_v47 = vld [vmem:[%s2714_s20 + $0x10] sm:$0xff] }
 0x32d   : > { %2281 = vmatprep.mubr.msk.f32.mxu1 %vm2518_vm2, %v2517_v12 }
 0x379   : > { %v931_v52 = vpop.f32.mrf.mxu1 }
 0x37a   : > { %v1164_v53 = vsel %vm1163_vm4, %v931_v52, -inf }
 0x37b   : > { %1165 = vmax.xlane.f32.xlu1 %v1164_v53  ;;  %v2258_v54 = vpop.f32.mrf.mxu1 }
 0x3e4   : > { %v1007_v55 = vpop.f32.mrf.mxu1 }
 0x3e5   : > { %v1167_v56 = vsel %vm1163_vm4, %v1007_v55, -inf }
 0x3e6   : > { %1168 = vmax.xlane.f32.xlu0 %v1167_v56  ;;  %v2263_v57 = vpop.f32.mrf.mxu1 }
 0x3e8   : > { %v1083_v58 = vpop.f32.mrf.mxu1 }
 0x3e9   : > { %v1170_v59 = vsel %vm1163_vm4, %v1083_v58, -inf }
 0x3ea   : > { %1171 = vmax.xlane.f32.xlu1 %v1170_v59  ;;  %v2268_v60 = vpop.f32.mrf.mxu1 }
 0x3ec   : > { %v1159_v61 = vpop.f32.mrf.mxu1 }
 0x3ed   : > { %v1173_v62 = vsel %vm1163_vm4, %v1159_v61, -inf }
 0x3ee   : > { %1174 = vmax.xlane.f32.xlu0 %v1173_v62  ;;  %v2273_v63 = vpop.f32.mrf.mxu1 }
 0x3fb   : > { %849 = vrot.lane.b32.xlu1 %v2799_v44, %s2520_s29 }
 0x404   : > { %v1166_v0 = vpop.xlane.xlu1 %1165 }
 0x405   : > { %v1176_v2 = vsub.f32 %v931_v52, %v1166_v0 }
 0x407   : > { %v1180_v3 = vmul.f32 1.442695, %v1176_v2 }
 0x409   : > { %2395 = vpow2.f32 %v1180_v3 }
 0x416   : > { %v2396_v4 = vpop.eup %2395 }
 0x417   : > { %v1188_v5 = vsel %vm1163_vm4, %v2396_v4, 0.0 }
 0x41f   : > { %1189 = vadd.xlane.f32.xlu1 %v1188_v5 }
 0x46f   : > { %v1169_v6 = vpop.xlane.xlu0 %1168 }
 0x470   : > { %v1177_v7 = vsub.f32 %v1007_v55, %v1169_v6 }
 0x472   : > { %v1182_v8 = vmul.f32 1.442695, %v1177_v7 }
 0x473   : > { %v1172_v9 = vpop.xlane.xlu1 %1171 }
 0x474   : > { %2397 = vpow2.f32 %v1182_v8  ;;  %v1178_v10 = vsub.f32 %v1083_v58, %v1172_v9  ;;  %v1650_v9 = vld [vmem:[%s2731_s1 + $0x78] sm:$0xff] }
 0x476   : > { %v1184_v11 = vmul.f32 1.442695, %v1178_v10  ;;  %v1648_v10 = vld [vmem:[%s2731_s1 + $0x68] sm:$0xff] }
 0x477   : > { %v1175_v13 = vpop.xlane.xlu0 %1174  ;;  %v850_v14 = vpop.permute.xlu1 %849 }
 0x478   : > { %2399 = vpow2.f32 %v1184_v11  ;;  %v1179_v15 = vsub.f32 %v1159_v61, %v1175_v13  ;;  %2280 = vmatpush3.msra.mxu1 %v850_v14  ;;  %v2177_v61 = vld [vmem:[%s3077_s19] ss:$0 sm:$0xff]  ;;  %v1646_v13 = vld [vmem:[%s2731_s1 + $0x58] sm:$0xff]  ;;  %v1645_v14 = vld [vmem:[%s2731_s1 + $0x50] sm:$0xff] }
 0x479   : > { %2289 = vmatprep.subr.mxu1 %v2517_v12  ;;  %v1647_v11 = vld [vmem:[%s2731_s1 + $0x60] sm:$0xff] }
 0x47a   : > { %v1186_v16 = vmul.f32 1.442695, %v1179_v15  ;;  %v1644_v15 = vld [vmem:[%s2731_s1 + $0x48] sm:$0xff] }
 0x47c   : > { %2401 = vpow2.f32 %v1186_v16  ;;  %v1643_v16 = vld [vmem:[%s2731_s1 + $0x40] sm:$0xff] }
 0x481   : > { %v2398_v17 = vpop.eup %2397 }
 0x482   : > { %v1191_v18 = vsel %vm1163_vm4, %v2398_v17, 0.0 }
 0x483   : > { %1192 = vadd.xlane.f32.xlu0 %v1191_v18  ;;  %v1641_v18 = vld [vmem:[%s2731_s1 + $0x30] sm:$0xff] }
 0x485   : > { %v2400_v19 = vpop.eup %2399 }
 0x486   : > { %v1194_v20 = vsel %vm1163_vm4, %v2400_v19, 0.0 }
 0x487   : > { %1195 = vadd.xlane.f32.xlu1 %v1194_v20  ;;  %v1639_v20 = vld [vmem:[%s2731_s1 + $0x20] sm:$0xff] }
 0x489   : > { %v2402_v21 = vpop.eup %2401 }
 0x48a   : > { %v1197_v22 = vsel %vm1163_vm4, %v2402_v21, 0.0 }
 0x48b   : > { %1198 = vadd.xlane.f32.xlu0 %v1197_v22  ;;  %v1637_v22 = vld [vmem:[%s2731_s1 + $0x10] sm:$0xff] }
 0x498   : > { %855 = vrot.lane.b32.xlu1 %v2799_v44, %s2519_s17  ;;  %s3081_s17 = sld [smem:[#allocation24_spill]] (!%p2183_p1) }
 0x4a1   : > { %852 = vrot.lane.b32.xlu0 %v2799_v44, %s2521_s24 }
 0x4a8   : > { %v1190_v23 = vpop.xlane.xlu1 %1189 }
 0x4a9   : > { %2403 = vrcp.f32 %v1190_v23  ;;  %v1636_v23 = vld [vmem:[%s2731_s1 + $0x8] sm:$0xff] }
 0x4b6   : > { %v2404_v24 = vpop.eup %2403 }
 0x4b7   : > { %v1201_v25 = vmul.f32 %v2404_v24, %v2396_v4  ;;  %v1635_v24 = vld [vmem:[%s2731_s1] sm:$0xff] }
 0x4b9   : > { %2277 = vmatmul.mubr.msk.f32.vlgmr.msra.gmra.mxu0 %vm1163_vm4, %v1201_v25 }
 0x4ba   : > { %2286 = vmatprep.mubr.msk.f32.mxu0 %vm2518_vm2, %v2517_v12 }
 0x50c   : > { %v1193_v26 = vpop.xlane.xlu0 %1192 }
 0x50d   : > { %2405 = vrcp.f32 %v1193_v26 }
 0x510   : > { %v1196_v27 = vpop.xlane.xlu1 %1195 }
 0x511   : > { %2407 = vrcp.f32 %v1196_v27 }
 0x514   : > { %v1199_v28 = vpop.xlane.xlu0 %1198  ;;  %v856_v32 = vpop.permute.xlu1 %855 }
 0x515   : > { %2409 = vrcp.f32 %v1199_v28 }
 0x518   : > { %v853_v29 = vpop.permute.xlu0 %852 }
 0x519   : > { %2285 = vmatpush3.msra.mxu0 %v853_v29  ;;  %v2179_v29 = vld [vmem:[%s3078_s16] ss:$0 sm:$0xff] }
 0x51a   : > { %v2406_v30 = vpop.eup %2405  ;;  %2294 = vmatprep.subr.mxu0 %v2517_v12 }
 0x51b   : > { %v1203_v31 = vmul.f32 %v2406_v30, %v2398_v17  ;;  %v1642_v17 = vld [vmem:[%s2731_s1 + $0x38] sm:$0xff] }
 0x51d   : > { %2282 = vmatmul.mubr.msk.f32.vlgmr.msra.gmra.mxu1 %vm1163_vm4, %v1203_v31  ;;  %v2180_v31 = vld [vmem:[%s3079_s13] ss:$0 sm:$0xff] }
 0x51e   : > { %v2408_v33 = vpop.eup %2407  ;;  %2290 = vmatpush3.msra.mxu1 %v856_v32  ;;  %2291 = vmatprep.mubr.msk.f32.mxu1 %vm2518_vm2, %v2517_v12 }
 0x51f   : > { %v1205_v34 = vmul.f32 %v2408_v33, %v2400_v19  ;;  %1682 = vmatprep.subr.mxu1 %v1650_v9  ;;  %v1640_v19 = vld [vmem:[%s2731_s1 + $0x28] sm:$0xff] }
 0x521   : > { %2287 = vmatmul.mubr.msk.f32.vlgmr.msra.gmra.mxu0 %vm1163_vm4, %v1205_v34  ;;  %v1820_v34 = vld [vmem:[%s2746_s2 + $0xf8] sm:$0xff] }
 0x522   : > { %v2410_v37 = vpop.eup %2409  ;;  %2310 = vmatprep.mubr.msk.f32.mxu0 %vm2518_vm2, %v2517_v12  ;;  %2295 = vmatpush3.msra.mxu0 %v1524_v40  ;;  %v1803_v40 = vld [vmem:[%s2746_s2 + $0x70] sm:$0xff] }
 0x523   : > { %v1207_v39 = vmul.f32 %v2410_v37, %v2402_v21  ;;  %2296 = vmatprep.subr.mxu0 %v2517_v12  ;;  %v1638_v21 = vld [vmem:[%s2731_s1 + $0x18] sm:$0xff] }
 0x524   : > { %2297 = vmatpush3.msra.mxu0 %v1523_v41  ;;  %v1804_v37 = vld [vmem:[%s2746_s2 + $0x78] sm:$0xff]  ;;  %v1818_v41 = vld [vmem:[%s2746_s2 + $0xe8] sm:$0xff] }
 0x525   : > { %2292 = vmatmul.mubr.msk.f32.vlgmr.msra.gmra.mxu1 %vm1163_vm4, %v1207_v39  ;;  %2298 = vmatprep.subr.mxu0 %v2517_v12  ;;  %v1819_v39 = vld [vmem:[%s2746_s2 + $0xf0] sm:$0xff] }
 0x526   : > { %1730 = vmatprep.mubr.f32.mxu1 %v2517_v12  ;;  %2299 = vmatpush3.msra.mxu0 %v1522_v42  ;;  %v1802_v42 = vld [vmem:[%s2746_s2 + $0x68] sm:$0xff] }
 0x527   : > { %2300 = vmatprep.subr.mxu0 %v2517_v12 }
 0x528   : > { %2301 = vmatpush3.msra.mxu0 %v1521_v45  ;;  %v1816_v45 = vld [vmem:[%s2746_s2 + $0xd8] sm:$0xff] }
 0x529   : > { %2302 = vmatprep.subr.mxu0 %v2517_v12 }
 0x52a   : > { %2303 = vmatpush3.msra.mxu0 %v1520_v46  ;;  %v1800_v46 = vld [vmem:[%s2746_s2 + $0x58] sm:$0xff] }
 0x52b   : > { %2304 = vmatprep.subr.mxu0 %v2517_v12 }
 0x52c   : > { %2305 = vmatpush3.msra.mxu0 %v1519_v47  ;;  %v1815_v47 = vld [vmem:[%s2746_s2 + $0xd0] sm:$0xff] }
 0x52d   : > { %2306 = vmatprep.subr.mxu0 %v2517_v12 }
 0x52e   : > { %2307 = vmatpush3.msra.mxu0 %v1518_v48  ;;  %v1799_v48 = vld [vmem:[%s2746_s2 + $0x50] sm:$0xff] }
 0x52f   : > { %2308 = vmatprep.subr.mxu0 %v2517_v12 }
 0x530   : > { %2309 = vmatpush3.msra.mxu0 %v1517_v49  ;;  %v1814_v49 = vld [vmem:[%s2746_s2 + $0xc8] sm:$0xff] }
 0x531   : > { %2219 = vmatprep.subr.mxu0 %v1820_v34 }
 0x579   : > { %v1277_v43 = vpop.f32.mrf.mxu0 }
 0x57b   : > { %v2278_v44 = vpop.f32.mrf.mxu0 }
 0x57c   : > { %v1801_v44 = vld [vmem:[%s2746_s2 + $0x60] sm:$0xff] }
 0x5dd   : > { %v1350_v50 = vpop.f32.mrf.mxu1 }
 0x5de   : > { %1501 = vrot.lane.b32.xlu1 %v1350_v50, %s2523_s15  ;;  %v1798_v50 = vld [vmem:[%s2746_s2 + $0x48] sm:$0xff] }
 0x5df   : > { %v2283_v51 = vpop.f32.mrf.mxu1 }
 0x5e0   : > { %v1813_v51 = vld [vmem:[%s2746_s2 + $0xc0] sm:$0xff] }
 0x5e1   : > { %v1423_v52 = vpop.f32.mrf.mxu0 }
 0x5e2   : > { %1505 = vrot.lane.b32.xlu0 %v1423_v52, %s2524_s25  ;;  %v1797_v52 = vld [vmem:[%s2746_s2 + $0x40] sm:$0xff] }
 0x5e3   : > { %v2288_v53 = vpop.f32.mrf.mxu0 }
 0x5e4   : > { %v1812_v53 = vld [vmem:[%s2746_s2 + $0xb8] sm:$0xff] }
 0x5e5   : > { %v1496_v54 = vpop.f32.mrf.mxu1 }
 0x5e6   : > { %1509 = vrot.lane.b32.xlu1 %v1496_v54, %s2525_s14  ;;  %v1796_v54 = vld [vmem:[%s2746_s2 + $0x38] sm:$0xff] }
 0x5e7   : > { %v2293_v55 = vpop.f32.mrf.mxu1 }
 0x5e8   : > { %v1811_v55 = vld [vmem:[%s2746_s2 + $0xb0] sm:$0xff] }
 0x650   : > { %v1502_v56 = vpop.permute.xlu1 %1501 }
 0x651   : > { %v1512_v12 = vsel %vm860_vm3, %v1277_v43, %v1502_v56  ;;  %v1817_v43 = vld [vmem:[%s2746_s2 + $0xe0] sm:$0xff]  ;;  %v1795_v56 = vld [vmem:[%s2746_s2 + $0x30] sm:$0xff] }
 0x654   : > { %v1506_v57 = vpop.permute.xlu0 %1505 }
 0x655   : > { %v1514_v58 = vsel %vm1513_vm5, %v1512_v12, %v1506_v57  ;;  %v1810_v57 = vld [vmem:[%s2746_s2 + $0xa8] sm:$0xff] }
 0x656   : > { %v1794_v12 = vld [vmem:[%s2746_s2 + $0x28] sm:$0xff] }
 0x658   : > { %v1510_v59 = vpop.permute.xlu1 %1509 }
 0x659   : > { %v1516_v60 = vsel %vm1515_vm6, %v1514_v58, %v1510_v59  ;;  %v1809_v58 = vld [vmem:[%s2746_s2 + $0xa0] sm:$0xff] }
 0x65a   : > { %2311 = vmatmul.mubr.msk.f32.vlgmr.msra.gmra.mxu0 %vm710_vm1, %v1516_v60  ;;  %v1793_v59 = vld [vmem:[%s2746_s2 + $0x20] sm:$0xff]  ;;  %v1808_v60 = vld [vmem:[%s2746_s2 + $0x98] sm:$0xff] }
 0x65b   : > { %2220 = vmatpush3.msra.mxu0 %v1804_v37 }
 0x65c   : > { %2221 = vmatprep.subr.mxu0 %v1819_v39 }
 0x65d   : > { %2222 = vmatpush3.msra.mxu0 %v1803_v40 }
 0x65e   : > { %2223 = vmatprep.subr.mxu0 %v1818_v41 }
 0x65f   : > { %2224 = vmatpush3.msra.mxu0 %v1802_v42 }
 0x660   : > { %2225 = vmatprep.subr.mxu0 %v1817_v43 }
 0x661   : > { %2226 = vmatpush3.msra.mxu0 %v1801_v44 }
 0x662   : > { %2227 = vmatprep.subr.mxu0 %v1816_v45 }
 0x663   : > { %2228 = vmatpush3.msra.mxu0 %v1800_v46 }
 0x664   : > { %2229 = vmatprep.subr.mxu0 %v1815_v47 }
 0x665   : > { %2230 = vmatpush3.msra.mxu0 %v1799_v48 }
 0x666   : > { %2231 = vmatprep.subr.mxu0 %v1814_v49 }
 0x667   : > { %2232 = vmatpush3.msra.mxu0 %v1798_v50 }
 0x668   : > { %2233 = vmatprep.subr.mxu0 %v1813_v51 }
 0x669   : > { %2234 = vmatpush3.msra.mxu0 %v1797_v52 }
 0x66a   : > { %2235 = vmatprep.subr.mxu0 %v1812_v53 }
 0x66b   : > { %2236 = vmatpush3.msra.mxu0 %v1796_v54 }
 0x66c   : > { %2237 = vmatprep.subr.mxu0 %v1811_v55 }
 0x66d   : > { %2238 = vmatpush3.msra.mxu0 %v1795_v56 }
 0x66e   : > { %2239 = vmatprep.subr.mxu0 %v1810_v57 }
 0x66f   : > { %2240 = vmatpush3.msra.mxu0 %v1794_v12 }
 0x670   : > { %2241 = vmatprep.subr.mxu0 %v1809_v58 }
 0x671   : > { %2242 = vmatpush3.msra.mxu0 %v1793_v59 }
 0x672   : > { %2243 = vmatprep.subr.mxu0 %v1808_v60 }
 0x71a   : > { %v1601_v62 = vpop.f32.mrf.mxu0 }
 0x71b   : > { %v1602_v63 = vadd.f32 %v2177_v61, %v1601_v62  ;;  %v1792_v61 = vld [vmem:[%s2746_s2 + $0x18] sm:$0xff]  ;;  %v1807_v62 = vld [vmem:[%s2746_s2 + $0x90] sm:$0xff] }
 0x71c   : > { %v2312_v0 = vpop.f32.mrf.mxu0  ;;  %2244 = vmatpush3.msra.mxu0 %v1792_v61 }
 0x71d   : > { %v2876_v2 = vadd.f32 %v1602_v63, %v2750_v1  ;;  %v1649_v1 = vld [vmem:[%s2731_s1 + $0x70] sm:$0xff]  ;;  %2245 = vmatprep.subr.mxu0 %v1807_v62  ;;  %v1806_v0 = vld [vmem:[%s2746_s2 + $0x88] sm:$0xff] }
 0x71e   : > { %1683 = vmatpush1.msra.mxu1 %v1649_v1  ;;  %v1791_v63 = vld [vmem:[%s2746_s2 + $0x10] sm:$0xff] }
 0x71f   : > { %v1608_v3 = vsel %vm710_vm1, %v2876_v2, 0.0  ;;  %1684 = vmatprep.subr.mxu1 %v1648_v10  ;;  %2246 = vmatpush3.msra.mxu0 %v1791_v63  ;;  %v2182_v63 = vld [vmem:[%s699_s0] ss:$0 sm:$0xff] }
 0x720   : > { %1609 = vadd.xlane.f32.xlu0 %v1608_v3  ;;  %1685 = vmatpush1.msra.mxu1 %v1647_v11  ;;  %v1790_v3 = vld [vmem:[%s2746_s2 + $0x8] sm:$0xff] }
 0x721   : > { %1686 = vmatprep.subr.mxu1 %v1646_v13  ;;  %2247 = vmatprep.subr.mxu0 %v1806_v0 }
 0x722   : > { %1687 = vmatpush1.msra.mxu1 %v1645_v14  ;;  %2248 = vmatpush3.msra.mxu0 %v1790_v3 }
 0x723   : > { %1688 = vmatprep.subr.mxu1 %v1644_v15 }
 0x724   : > { %1689 = vmatpush1.msra.mxu1 %v1643_v16 }
 0x725   : > { %1690 = vmatprep.subr.mxu1 %v1642_v17 }
 0x726   : > { %1691 = vmatpush1.msra.mxu1 %v1641_v18 }
 0x727   : > { %1692 = vmatprep.subr.mxu1 %v1640_v19 }
 0x728   : > { %1693 = vmatpush1.msra.mxu1 %v1639_v20 }
 0x729   : > { %1694 = vmatprep.subr.mxu1 %v1638_v21 }
 0x72a   : > { %1695 = vmatpush1.msra.mxu1 %v1637_v22 }
 0x72b   : > { %1696 = vmatprep.subr.mxu1 %v1636_v23 }
 0x72c   : > { %1697 = vmatpush1.msra.mxu1 %v1635_v24 }
 0x7a9   : > { %v1610_v4 = vpop.xlane.xlu0 %1609 }
 0x7aa   : > { %v1611_v5 = vmul.f32 0.015625, %v1610_v4  ;;  %v1805_v4 = vld [vmem:[%s2746_s2 + $0x80] sm:$0xff] }
 0x7ab   : > { %2249 = vmatprep.subr.mxu0 %v1805_v4 }
 0x7ac   : > { %v1612_v6 = vsub.f32 %v2876_v2, %v1611_v5  ;;  %v1789_v5 = vld [vmem:[%s2746_s2] sm:$0xff] }
 0x7ad   : > { %2250 = vmatpush3.msra.mxu0 %v1789_v5 }
 0x7ae   : > { %v1613_v7 = vmul.f32 %v1612_v6, %v1612_v6 }
 0x7b0   : > { %v1614_v8 = vsel %vm710_vm1, %v1613_v7, 0.0 }
 0x7b1   : > { %1615 = vadd.xlane.f32.xlu1 %v1614_v8 }
 0x83a   : > { %v1616_v25 = vpop.xlane.xlu1 %1615 }
 0x83b   : > { %v1617_v26 = vmul.f32 0.015625, %v1616_v25 }
 0x83d   : > { %v1618_v27 = vadd.f32 1e-06, %v1617_v26 }
 0x83f   : > { %2411 = vrsqrt.f32 %v1618_v27 }
 0x84c   : > { %v2412_v28 = vpop.eup %2411 }
 0x84d   : > { %v1620_v30 = vmul.f32 %v2412_v28, %v1612_v6  ;;  %v1651_v6 = vld [vmem:[%s2736_s28] sm:$0x3] }
 0x84e   : > { %v1656_v7 = vrot.slane %v1651_v6, %v759_v36  ;;  %v1660_v8 = vrot.slane %v1651_v6, %v763_v38 }
 0x84f   : > { %v1627_v32 = vmul.f32 %v2179_v29, %v1620_v30 }
 0x851   : > { %v1634_v33 = vadd.f32 %v2180_v31, %v1627_v32 }
 0x853   : > { %2181 = vmatmul.mubr.msk.f32.vlgmr.msra.gmra.mxu1 %vm710_vm1, %v1634_v33 }
 0x913   : > { %v1732_v9 = vpop.f32.mrf.mxu1 }
 0x914   : > { %v1733_v1 = vadd.f32 %v1732_v9, %v1656_v7 }
 0x915   : > { %v1734_v10 = vpop.f32.mrf.mxu1 }
 0x916   : > { %v1739_v11 = vmul.f32 0.70710677, %v1733_v1  ;;  %v1735_v13 = vadd.f32 %v1734_v10, %v1660_v8  ;;  %v1737_v59 = vmul.f32 0.5, %v1733_v1 }
 0x918   : > { %v1741_v14 = vand.u32 2147483647, %v1739_v11  ;;  %v1740_v15 = vmul.f32 0.70710677, %v1735_v13  ;;  %vm1779_vm7 = vcmp.ge.f32.partialorder %v1739_v11, 0.0  ;;  %v1738_v12 = vmul.f32 0.5, %v1735_v13 }
 0x91a   : > { %v1743_v16 = vmul.f32 0.3275911, %v1741_v14  ;;  %v1742_v17 = vand.u32 2147483647, %v1740_v15  ;;  %v1767_v21 = vsub.f32 0.0, %v1741_v14  ;;  %vm1780_vm8 = vcmp.ge.f32.partialorder %v1740_v15, 0.0 }
 0x91c   : > { %v1745_v18 = vadd.f32 1.0, %v1743_v16  ;;  %v1744_v19 = vmul.f32 0.3275911, %v1742_v17  ;;  %v1768_v22 = vsub.f32 0.0, %v1742_v17  ;;  %v1769_v36 = vmul.f32 %v1767_v21, %v1741_v14 }
 0x91e   : > { %2413 = vrcp.f32 %v1745_v18  ;;  %v1746_v20 = vadd.f32 1.0, %v1744_v19  ;;  %v1770_v35 = vmul.f32 %v1768_v22, %v1742_v17  ;;  %v1771_v24 = vmul.f32 1.442695, %v1769_v36 }
 0x920   : > { %2415 = vrcp.f32 %v1746_v20  ;;  %v1773_v27 = vmul.f32 1.442695, %v1770_v35 }
 0x921   : > { %2417 = vpow2.f32 %v1771_v24 }
 0x922   : > { %2419 = vpow2.f32 %v1773_v27 }
 0x92b   : > { %v2414_v23 = vpop.eup %2413 }
 0x92c   : > { %v1749_v38 = vmul.f32 1.0614054, %v2414_v23 }
 0x92d   : > { %v2416_v25 = vpop.eup %2415 }
 0x92e   : > { %v1751_v26 = vadd.f32 -1.4531521, %v1749_v38  ;;  %v1750_v28 = vmul.f32 1.0614054, %v2416_v25  ;;  %v2418_v45 = vpop.eup %2417 }
 0x92f   : > { %v2420_v49 = vpop.eup %2419 }
 0x930   : > { %v1753_v29 = vmul.f32 %v2414_v23, %v1751_v26  ;;  %v1752_v30 = vadd.f32 -1.4531521, %v1750_v28 }
 0x932   : > { %v1755_v31 = vadd.f32 1.4214138, %v1753_v29  ;;  %v1754_v32 = vmul.f32 %v2416_v25, %v1752_v30 }
 0x934   : > { %v1757_v33 = vmul.f32 %v2414_v23, %v1755_v31  ;;  %v1756_v34 = vadd.f32 1.4214138, %v1754_v32 }
 0x936   : > { %v1759_v37 = vadd.f32 -0.28449672, %v1757_v33  ;;  %v1758_v39 = vmul.f32 %v2416_v25, %v1756_v34 }
 0x938   : > { %v1761_v40 = vmul.f32 %v2414_v23, %v1759_v37  ;;  %v1760_v41 = vadd.f32 -0.28449672, %v1758_v39 }
 0x93a   : > { %v1763_v42 = vadd.f32 0.2548296, %v1761_v40  ;;  %v1762_v43 = vmul.f32 %v2416_v25, %v1760_v41 }
 0x93c   : > { %v1765_v44 = vmul.f32 %v2414_v23, %v1763_v42  ;;  %v1764_v46 = vadd.f32 0.2548296, %v1762_v43 }
 0x93e   : > { %v1775_v47 = vmul.f32 %v2418_v45, %v1765_v44  ;;  %v1766_v48 = vmul.f32 %v2416_v25, %v1764_v46 }
 0x940   : > { %v1777_v50 = vsub.f32 1.0, %v1775_v47  ;;  %v1776_v51 = vmul.f32 %v2420_v49, %v1766_v48 }
 0x942   : > { %v1781_v52 = vsub.f32 0.0, %v1777_v50  ;;  %v1778_v53 = vsub.f32 1.0, %v1776_v51 }
 0x944   : > { %v1783_v54 = vsel %vm1779_vm7, %v1777_v50, %v1781_v52  ;;  %v1782_v55 = vsub.f32 0.0, %v1778_v53 }
 0x945   : > { %v1785_v56 = vadd.f32 1.0, %v1783_v54 }
 0x946   : > { %v1784_v57 = vsel %vm1780_vm8, %v1778_v53, %v1782_v55 }
 0x947   : > { %v1786_v58 = vadd.f32 1.0, %v1784_v57  ;;  %v1787_v61 = vmul.f32 %v1785_v56, %v1737_v59 }
 0x949   : > { %v1788_v60 = vmul.f32 %v1786_v58, %v1738_v12 }
 0x94b   : > { %1892 = vmatprep.mubr.f32.mxu0 %v1788_v60 }
 0x94c   : > { %1893 = vmatmul.mubr.f32.vlgmr.msra.gmra.mxu0 %v1787_v61 }
 0xa0c   : > { %v2251_v62 = vpop.f32.mrf.mxu0 }
 0xa0e   : > { %v2252_v0 = vpop.f32.mrf.mxu0 }
 0xa0f   : > { %v2253_v3 = vadd.f32 %v2252_v0, %v2251_v62 }
 0xa11   : > { %v1895_v4 = vadd.f32 %v2253_v3, %v2182_v63  ;;  %1903 = sbr.rel (%p2183_p1) target bundleno = 2891 (0xb4b), region = 88 }
 0xa13   : > { %v1898_v5 = vadd.f32 %v1895_v4, %v2876_v2 }
 0xa15   : > { %1899 = vst.msk [vmem:[#allocation2] sm:$0xff] %vm710_vm1, %v1898_v5 }
 0xa16   : > { %v1906_v6 = vsel %vm710_vm1, %v1898_v5, 0.0  ;;  %v2184_v15 = vld [vmem:[%s3081_s17] ss:$0 sm:$0xff] }
 0xa17   : > { %1907 = vadd.xlane.f32.xlu0 %v1906_v6  ;;  %v2185_v17 = vld [vmem:[%s3082_s26] ss:$0 sm:$0xff] }
 0xaa0   : > { %v1908_v7 = vpop.xlane.xlu0 %1907 }
 0xaa1   : > { %v1909_v8 = vmul.f32 0.015625, %v1908_v7 }
 0xaa3   : > { %v1910_v9 = vsub.f32 %v1898_v5, %v1909_v8 }
 0xaa5   : > { %v1911_v1 = vmul.f32 %v1910_v9, %v1910_v9 }
 0xaa7   : > { %v1912_v10 = vsel %vm710_vm1, %v1911_v1, 0.0 }
 0xaa8   : > { %1913 = vadd.xlane.f32.xlu0 %v1912_v10 }
 0xb31   : > { %v1914_v11 = vpop.xlane.xlu0 %1913 }
 0xb32   : > { %v1915_v13 = vmul.f32 0.015625, %v1914_v11 }
 0xb34   : > { %v1916_v14 = vadd.f32 1e-06, %v1915_v13 }
 0xb36   : > { %2421 = vrsqrt.f32 %v1916_v14 }
 0xb43   : > { %v2422_v2 = vpop.eup %2421 }
 0xb44   : > { %v1918_v16 = vmul.f32 %v2422_v2, %v1910_v9 }
 0xb46   : > { %v1925_v18 = vmul.f32 %v2184_v15, %v1918_v16 }
 0xb48   : > { %v1932_v19 = vadd.f32 %v2185_v17, %v1925_v18 }
 0xb4a   : > { %1933 = vst.msk [vmem:[%s649_s3] sm:$0xff] %vm710_vm1, %v1932_v19 }
 0xb4b PF: > { %s3083_s15 = sld [smem:[#allocation10_spill]]  ;;  %s1948_s16 = sshll.u32 %s649_s3, 4  ;;  %s1949_s16 = int_to_ptr.vmem [resolvable:$true] %s1948_s16 }
 0xb4c   : > { %s3084_s25 = sld [smem:[#allocation7_spill]]  ;;  %s2423_s13 = scalar_lea.vmem %s1949_s16, 128 }
 0xb4d   : > { %s3086_s30 = sld [smem:[#allocation26_spill]]  ;;  %p2424_p2 = scmp.ne.s32.totalorder %s1949_s16, %s2423_s13 }
 0xb4e   : > { %s2526_s28 = smov [#allocation3]  }
 0xb4f   : > { %p2425_p4 = pnand %p2424_p2, %p2656_p3  ;;  %s2427_s2 = sshll.u32 %s2526_s28, 4  ;;  %s2428_s2 = int_to_ptr.vmem [resolvable:$false] %s2427_s2 }
 0xb50   : > { %s2429_s21 = scalar_lea.vmem %s2428_s2, 256  ;;  %p2430_p6 = scmp.lt.s32.totalorder %s1949_s16, %s2428_s2 }
 0xb51   : > { %s2187_s20 = sshll.u32 %s3083_s15, 7  ;;  %p2426_p5 = pneg %p2425_p4 }
 0xb52   : > { %s3087_s1 = sand.u32 1, %s3084_s25   ;;  %p2431_p7 = scmp.lt.s32.totalorder %s2429_s21, %s2423_s13 }
 0xb53   : > { %s1946_s27 = scalar_lea.hbm %s3086_s30, %s2187_s20  ;;  %s1935_s22 = scalar_lea.sflag [#allocation4], %s3087_s1 }
 0xb54   : > { %p2432_p8 = por %p2431_p7, %p2430_p6 }
 0xb56   : > { %p2433_p10 = pnand %p2432_p8, %p2426_p5 }
 0xb58   : > { %2436 = shalt.err (!%p2433_p10)
}
 0xb59   : > { %s2437_s18 = scalar_lea.hbm %s1946_s27, 128  ;;  %s2441_s0 = scalar_lea.hbm %s3086_s30, 256 }
 0xb5a   : > { %p2438_p11 = scmp.ne.s32.totalorder %s1946_s27, %s2437_s18  ;;  %p2442_p0 = scmp.lt.s32.totalorder %s1946_s27, %s3086_s30 }
 0xb5b   : > { %p2443_p1 = scmp.lt.s32.totalorder %s2441_s0, %s2437_s18 }
 0xb5c   : > { %p2439_p12 = pnand %p2438_p11, %p2656_p3 }
 0xb5d   : > { %p2444_p2 = por %p2443_p1, %p2442_p0 }
 0xb5e   : > { %p2440_p13 = pneg %p2439_p12 }
 0xb60   : > { %p2445_p4 = pnand %p2444_p2, %p2440_p13 }
 0xb62   : > { %2448 = shalt.err (!%p2445_p4)
}
 0xb63   : > { %2313 = dma.vmem_to_hbm [thread:$0]  (%p2656_p3), %s1949_s16, 128, %s1946_s27, %s1935_s22  }
 0xb64 PF: > { %s3088_s24 = sld [smem:[#allocation13_spill]] }
 0xb65   : > { %s3089_s26 = sld [smem:[#allocation6_spill]] }
 0xb6a   : > { %p2319_p5 = scmp.ge.s32.totalorder %s3088_s24, 2 }
 0xb6b   : > { %s1960_s25 = sand.u32 1, %s3089_s26  }
 0xb6c   : > { %p2316_p6 = pnand %p2319_p5, %p2666_p9  ;;  %s1961_s20 = scalar_lea.sflag [#allocation4], %s1960_s25 }
 0xb6e   : > { %p2317_p7 = pneg %p2316_p6 }
 0xb70   : > { %2482 = dma.done.wait (%p2317_p7), %s1961_s20, 128  }
 0xb71   : > { %2484 = vsyncadd (%p2317_p7), %s1961_s20, 4294967168  ;;  %s28_s25 = sadd.s32 1, %s3088_s24   ;;  %s3091_s18 = sld [smem:[#allocation7_spill]] }
 0xb72   : > { %p25_p8 = scmp.ge.s32.totalorder %s28_s25, 6   ;;  %s3092_s19 = sld [smem:[#allocation8_spill]] }
 0xb73   : > { %s3093_s20 = sld [smem:[#allocation18_spill]] }
 0xb74   : > { %s3094_s21 = sld [smem:[#allocation11_spill]]  ;;  %27 = sbr.rel (!%p25_p8) target bundleno = 14 (0xe), region = 159 }
 0xb75   : > { %s3095_s22 = sld [smem:[#allocation12_spill]] }
 0xb76   : > { %s3096_s23 = sld [smem:[#allocation14_spill]] }
 0xb77   : > { %s3097_s24 = sld [smem:[#allocation16_spill]] }
 0xb79   :  { %1966 = vsyncpa [#allocation4], 1 }
 0xb7a   :  { %1968 = vsyncpa [#allocation4 + $0x1], 1 }

</bundles_post_ra>
